<compile_context>
chip_gen: v7x
topology: tpu7x:2x2x1
jax: 0.10.0
libtpu: 0.0.40
codegen_flags: <defaults>
</compile_context>

<pallas_src>
import functools
import math

import jax
import jax.numpy as jnp
from jax import lax
from jax.experimental import pallas as pl
from jax.experimental.pallas import tpu as pltpu


# ----------------------------- in-kernel helpers ----------------------------

def _softmax_lastdim(s):
    m = jnp.max(s, axis=-1, keepdims=True)
    e = jnp.exp(s - m)
    denom = jnp.sum(e, axis=-1, keepdims=True)
    return e * pl.reciprocal(denom, approx=True)


def _layernorm(z, gamma, beta, eps):
    mean = jnp.mean(z, axis=-1, keepdims=True)
    var = jnp.mean((z - mean) ** 2, axis=-1, keepdims=True)
    return (z - mean) * lax.rsqrt(var + eps) * gamma + beta


def _mha_heads(q, k, v, wo, bo, bias, head_num):
    """Per-head SDPA with the output projection folded into the head loop.

    q,k,v: bf16 (Tq,D)/(Tk,D); wo: bf16 (D, D); bo: f32 (1, D).
    Returns f32 (Tq, D) pre-norm attention output.  No head-concat / lane relayout:
    each head's (Tq, hd) context goes straight through the matching 8-sublane
    row-slice of wo and is accumulated in f32 vregs.
    """
    Tq = q.shape[0]
    D = wo.shape[1]
    hd = q.shape[1] // head_num
    att = jnp.broadcast_to(bo, (Tq, D)).astype(jnp.float32)
    for h in range(head_num):                      # static unroll, small head count
        qh = q[:, h * hd:(h + 1) * hd]
        kh = k[:, h * hd:(h + 1) * hd]
        vh = v[:, h * hd:(h + 1) * hd]
        # q @ k^T without materializing a transpose (contract dim 1 of both operands);
        # temperature is already folded into wq/bq.
        s = lax.dot_general(qh, kh, (((1,), (1,)), ((), ())),
                            preferred_element_type=jnp.float32)
        if bias is not None:
            s = s + bias
        p = _softmax_lastdim(s)
        ctx = jnp.dot(p.astype(v.dtype), vh, preferred_element_type=jnp.float32)
        att = att + jnp.dot(ctx.astype(wo.dtype), wo[h * hd:(h + 1) * hd, :],
                            preferred_element_type=jnp.float32)
    return att


# ----------------------------- fused layer kernel ---------------------------

def _decoder_layer_kernel(
        tgt_ref, src_ref,
        wqkv_s_ref, bqkv_s_ref, wo_s_ref, bo_s_ref, ln1_g_ref, ln1_b_ref,
        wq_c_ref, bq_c_ref, wkv_c_ref, bkv_c_ref, wo_c_ref, bo_c_ref,
        ln2_g_ref, ln2_b_ref,
        w1_ref, b1_ref, w2_ref, b2_ref, ln3_g_ref, ln3_b_ref,
        out_ref, *, head_num, eps):
    x = tgt_ref[...]                                   # (T, D) f32
    T, D = x.shape
    xb = x.astype(jnp.bfloat16)

    # ---- self attention: fused QKV matmul, in-kernel causal additive bias ----
    qkv = jnp.dot(xb, wqkv_s_ref[...],
                  preferred_element_type=jnp.float32) + bqkv_s_ref[...]
    q = qkv[:, 0 * D:1 * D].astype(jnp.bfloat16)       # pre-scaled by 1/sqrt(D)
    k = qkv[:, 1 * D:2 * D].astype(jnp.bfloat16)
    v = qkv[:, 2 * D:3 * D].astype(jnp.bfloat16)
    row = lax.broadcasted_iota(jnp.int32, (T, T), 0)
    col = lax.broadcasted_iota(jnp.int32, (T, T), 1)
    # finite -1e9 (not -inf): safe because the causal mask never fully masks a row.
    causal_bias = jnp.where(col > row, jnp.float32(-1e9), jnp.float32(0.0))
    att1 = _mha_heads(q, k, v, wo_s_ref[...], bo_s_ref[...], causal_bias, head_num)
    out1 = _layernorm(att1 + x, ln1_g_ref[...], ln1_b_ref[...], eps)

    # ---- cross attention: query = PRE-NORM att1 (reference quirk), fused KV, no mask ----
    srcb = src_ref[...].astype(jnp.bfloat16)           # (S, Ds)
    qc = (jnp.dot(att1.astype(jnp.bfloat16), wq_c_ref[...],
                  preferred_element_type=jnp.float32) + bq_c_ref[...]
          ).astype(jnp.bfloat16)
    kvc = jnp.dot(srcb, wkv_c_ref[...],
                  preferred_element_type=jnp.float32) + bkv_c_ref[...]
    kc = kvc[:, 0 * D:1 * D].astype(jnp.bfloat16)
    vc = kvc[:, 1 * D:2 * D].astype(jnp.bfloat16)
    att2 = _mha_heads(qc, kc, vc, wo_c_ref[...], bo_c_ref[...], None, head_num)
    out2 = _layernorm(att2 + out1, ln2_g_ref[...], ln2_b_ref[...], eps)

    # ---- feed-forward: Linear -> ReLU -> Linear -> +res -> LN; hidden stays in vregs ----
    h = jnp.dot(out2.astype(jnp.bfloat16), w1_ref[...],
                preferred_element_type=jnp.float32) + b1_ref[...]
    h = jnp.maximum(h, 0.0)
    ff = jnp.dot(h.astype(jnp.bfloat16), w2_ref[...],
                 preferred_element_type=jnp.float32) + b2_ref[...]
    out3 = _layernorm(ff + out2, ln3_g_ref[...], ln3_b_ref[...], eps)
    out_ref[...] = out3.astype(out_ref.dtype)


# ----------------------------- Pallas wrapper -------------------------------

def decoder_layer_forward(tgt, src, params, head_num, eps=1e-5):
    """TransformerDecoderLayer.forward with tgt_prev=None (eval mode), causal tgt_mask."""
    B, T, D = tgt.shape
    S, Ds = src.shape[1], src.shape[2]
    F = params["w1"].shape[1]
    hd = D // head_num

    def xspec(t, d):
        return pl.BlockSpec((pl.Squeezed(), t, d), lambda b: (b, 0, 0))

    def wspec(r, c):
        return pl.BlockSpec((r, c), lambda b: (0, 0))

    kern = functools.partial(_decoder_layer_kernel, head_num=head_num, eps=eps)

    in_specs = [
        xspec(T, D), xspec(S, Ds),
        wspec(D, 3 * D), wspec(1, 3 * D), wspec(D, D), wspec(1, D),
        wspec(1, D), wspec(1, D),
        wspec(D, D), wspec(1, D), wspec(Ds, 2 * D), wspec(1, 2 * D),
        wspec(D, D), wspec(1, D), wspec(1, D), wspec(1, D),
        wspec(D, F), wspec(1, F), wspec(F, D), wspec(1, D),
        wspec(1, D), wspec(1, D),
    ]
    args = [
        tgt, src,
        params["wqkv_s"], params["bqkv_s"], params["wo_s"], params["bo_s"],
        params["ln1_g"], params["ln1_b"],
        params["wq_c"], params["bq_c"], params["wkv_c"], params["bkv_c"],
        params["wo_c"], params["bo_c"], params["ln2_g"], params["ln2_b"],
        params["w1"], params["b1"], params["w2"], params["b2"],
        params["ln3_g"], params["ln3_b"],
    ]

    flops = B * (
        2 * T * D * 3 * D                    # self QKV
        + 2 * head_num * T * T * hd * 2      # self scores + P@V
        + 2 * T * D * D                      # self out-proj (per-head accumulation)
        + 2 * T * D * D                      # cross Q
        + 2 * S * Ds * 2 * D                 # cross KV
        + 2 * head_num * T * S * hd * 2      # cross scores + P@V
        + 2 * T * D * D                      # cross out-proj
        + 2 * T * D * F * 2                  # FFN
    )
    transcendentals = B * (head_num * (T * T + T * S) + 6 * T)
    param_bytes = sum(int(a.size) * a.dtype.itemsize for a in args[2:])
    bytes_accessed = (int(tgt.size) + int(src.size)) * 4 + param_bytes + B * T * D * 4

    return pl.pallas_call(
        kern,
        out_shape=jax.ShapeDtypeStruct((B, T, D), jnp.float32),
        grid=(B,),
        in_specs=in_specs,
        out_specs=xspec(T, D),
        compiler_params=pltpu.CompilerParams(
            dimension_semantics=("parallel",)),    # 1 batch per TC on v7x's 2 cores
        cost_estimate=pl.CostEstimate(flops=flops,
                                      transcendentals=transcendentals,
                                      bytes_accessed=bytes_accessed),
    )(*args)


# ----------------------------- Pure-JAX reference ---------------------------

def _linear_ref(x, w, b):
    return x @ w.T + b


def _mha_ref(q_in, k_in, v_in, mask_bool, p, H):
    B, Tq, _ = q_in.shape
    Tk = k_in.shape[1]
    D = p["wq"].shape[0]
    hd = D // H
    temperature = float(D) ** 0.5
    q = _linear_ref(q_in, p["wq"], p["bq"]).reshape(B, Tq, H, hd).transpose(0, 2, 1, 3)
    k = _linear_ref(k_in, p["wk"], p["bk"]).reshape(B, Tk, H, hd).transpose(0, 2, 1, 3)
    v = _linear_ref(v_in, p["wv"], p["bv"]).reshape(B, Tk, H, hd).transpose(0, 2, 1, 3)
    s = jnp.einsum("bhqd,bhkd->bhqk", q, k) / temperature
    if mask_bool is not None:
        s = jnp.where(mask_bool[:, None, :, :], -jnp.inf, s)
    a = jax.nn.softmax(s, axis=-1)
    o = jnp.einsum("bhqk,bhkd->bhqd", a, v).transpose(0, 2, 1, 3).reshape(B, Tq, D)
    return _linear_ref(o, p["wo"], p["bo"])


def _ln_ref(z, g, b, eps=1e-5):
    m = z.mean(-1, keepdims=True)
    v = ((z - m) ** 2).mean(-1, keepdims=True)
    return (z - m) / jnp.sqrt(v + eps) * g + b


def decoder_layer_ref(tgt, src, tgt_mask_bool, raw, head_num):
    att = _mha_ref(tgt, tgt, tgt, tgt_mask_bool, raw["self_attn"], head_num)
    out = _ln_ref(att + tgt, raw["ln1_g"], raw["ln1_b"])
    att2 = _mha_ref(att, src, src, None, raw["cross_attn"], head_num)
    out = _ln_ref(att2 + out, raw["ln2_g"], raw["ln2_b"])
    h = jnp.maximum(_linear_ref(out, raw["ff_w1"], raw["ff_b1"]), 0.0)
    ff = _linear_ref(h, raw["ff_w2"], raw["ff_b2"])
    out = _ln_ref(ff + out, raw["ln3_g"], raw["ln3_b"])
    return out


# ----------------------------- Parameters -----------------------------------

def make_params(key, input_size, src_size, filter_size):
    """Torch-layout parameters: Linear weight is (Dout, Din), bias (Dout,)."""
    def nrm(k, shape, scale=0.05):
        return scale * jax.random.normal(k, shape, jnp.float32)

    ks = jax.random.split(key, 24)
    D, Ds, F = input_size, src_size, filter_size
    return {
        "self_attn": {
            "wq": nrm(ks[0], (D, D)), "bq": nrm(ks[1], (D,)),
            "wk": nrm(ks[2], (D, D)), "bk": nrm(ks[3], (D,)),
            "wv": nrm(ks[4], (D, D)), "bv": nrm(ks[5], (D,)),
            "wo": nrm(ks[6], (D, D)), "bo": nrm(ks[7], (D,)),
        },
        "cross_attn": {
            "wq": nrm(ks[8], (D, D)), "bq": nrm(ks[9], (D,)),
            "wk": nrm(ks[10], (D, Ds)), "bk": nrm(ks[11], (D,)),
            "wv": nrm(ks[12], (D, Ds)), "bv": nrm(ks[13], (D,)),
            "wo": nrm(ks[14], (D, D)), "bo": nrm(ks[15], (D,)),
        },
        "ln1_g": jnp.ones((D,), jnp.float32), "ln1_b": jnp.zeros((D,), jnp.float32),
        "ln2_g": jnp.ones((D,), jnp.float32), "ln2_b": jnp.zeros((D,), jnp.float32),
        "ln3_g": jnp.ones((D,), jnp.float32), "ln3_b": jnp.zeros((D,), jnp.float32),
        "ff_w1": nrm(ks[16], (F, D)), "ff_b1": nrm(ks[17], (F,)),
        "ff_w2": nrm(ks[18], (D, F)), "ff_b2": nrm(ks[19], (D,)),
    }


def prepare_params(raw, input_size):
    """One-time host-side layout prep:
       * weights -> (Din, Dout), fused QKV / KV, cast to bf16
       * 1/sqrt(q_channels) temperature folded into wq / bq
       * biases / LN params -> (1, D) f32
    """
    D = input_size
    inv_temp = 1.0 / math.sqrt(float(D))        # reference quirk: sqrt(q_channels)
    sa, ca = raw["self_attn"], raw["cross_attn"]
    bf16 = jnp.bfloat16

    wqkv_s = jnp.concatenate(
        [sa["wq"].T * inv_temp, sa["wk"].T, sa["wv"].T], axis=1).astype(bf16)
    bqkv_s = jnp.concatenate(
        [sa["bq"] * inv_temp, sa["bk"], sa["bv"]]).reshape(1, -1)

    wkv_c = jnp.concatenate([ca["wk"].T, ca["wv"].T], axis=1).astype(bf16)
    bkv_c = jnp.concatenate([ca["bk"], ca["bv"]]).reshape(1, -1)

    return {
        "wqkv_s": wqkv_s, "bqkv_s": bqkv_s,
        "wo_s": sa["wo"].T.astype(bf16), "bo_s": sa["bo"].reshape(1, -1),
        "ln1_g": raw["ln1_g"].reshape(1, -1), "ln1_b": raw["ln1_b"].reshape(1, -1),
        "wq_c": (ca["wq"].T * inv_temp).astype(bf16),
        "bq_c": (ca["bq"] * inv_temp).reshape(1, -1),
        "wkv_c": wkv_c, "bkv_c": bkv_c,
        "wo_c": ca["wo"].T.astype(bf16), "bo_c": ca["bo"].reshape(1, -1),
        "ln2_g": raw["ln2_g"].reshape(1, -1), "ln2_b": raw["ln2_b"].reshape(1, -1),
        "w1": raw["ff_w1"].T.astype(bf16), "b1": raw["ff_b1"].reshape(1, -1),
        "w2": raw["ff_w2"].T.astype(bf16), "b2": raw["ff_b2"].reshape(1, -1),
        "ln3_g": raw["ln3_g"].reshape(1, -1), "ln3_b": raw["ln3_b"].reshape(1, -1),
    }


# ----------------------------- Main ------------------------------------------

if __name__ == "__main__":
    B, T, S = 2, 8, 16                 # batch, tgt seq, src seq
    input_size, src_size = 32, 64
    filter_size, head_num = 64, 4

    key = jax.random.PRNGKey(0)
    k_tgt, k_src, k_par = jax.random.split(key, 3)
    tgt = jax.random.normal(k_tgt, (B, T, input_size), jnp.float32)
    src = jax.random.normal(k_src, (B, S, src_size), jnp.float32)
    # causal mask (True == masked), used only by the pure-JAX reference; the kernel
    # builds the same causal additive bias from iota in VMEM.
    tgt_mask = jnp.broadcast_to(
        jnp.triu(jnp.ones((T, T), jnp.bool_), k=1), (B, T, T))

    raw = make_params(k_par, input_size, src_size, filter_size)
    prepped = jax.tree_util.tree_map(jnp.asarray, prepare_params(raw, input_size))

    fwd = jax.jit(functools.partial(decoder_layer_forward, head_num=head_num))
    out = jax.block_until_ready(fwd(tgt, src, prepped))

    ref = decoder_layer_ref(tgt, src, tgt_mask, raw, head_num)
    assert out.shape == (B, T, input_size)
    # bf16 MXU operands + approx-reciprocal softmax -> looser tolerance vs f32 reference
    max_err = float(jnp.max(jnp.abs(out - ref)))
    assert jnp.allclose(out, ref, atol=5e-2, rtol=5e-2), f"mismatch vs reference: {max_err}"

    # TODO(synk): nn.Dropout layers are identity (eval mode); no RNG dropout in kernels.
    # TODO(synk): the self-attn mask is assumed to be the standard causal mask (built
    #             in-kernel); an arbitrary tgt_mask would be passed as an additive-bias input.
    # TODO(synk): tgt_prev (KV-cache) branch of the reference forward is not implemented.
    print("KERNEL_OK")
</pallas_src>

<mosaic_0001>
module attributes {stable_mosaic.version = 11 : i64} {
  func.func @_decoder_layer_kernel(%arg0: i32, %arg1: memref<1x8x32xf32, #tpu.memory_space<vmem>>, %arg2: memref<1x16x64xf32, #tpu.memory_space<vmem>>, %arg3: memref<32x96xbf16, #tpu.memory_space<vmem>>, %arg4: memref<1x96xf32, #tpu.memory_space<vmem>>, %arg5: memref<32x32xbf16, #tpu.memory_space<vmem>>, %arg6: memref<1x32xf32, #tpu.memory_space<vmem>>, %arg7: memref<1x32xf32, #tpu.memory_space<vmem>>, %arg8: memref<1x32xf32, #tpu.memory_space<vmem>>, %arg9: memref<32x32xbf16, #tpu.memory_space<vmem>>, %arg10: memref<1x32xf32, #tpu.memory_space<vmem>>, %arg11: memref<64x64xbf16, #tpu.memory_space<vmem>>, %arg12: memref<1x64xf32, #tpu.memory_space<vmem>>, %arg13: memref<32x32xbf16, #tpu.memory_space<vmem>>, %arg14: memref<1x32xf32, #tpu.memory_space<vmem>>, %arg15: memref<1x32xf32, #tpu.memory_space<vmem>>, %arg16: memref<1x32xf32, #tpu.memory_space<vmem>>, %arg17: memref<32x64xbf16, #tpu.memory_space<vmem>>, %arg18: memref<1x64xf32, #tpu.memory_space<vmem>>, %arg19: memref<64x32xbf16, #tpu.memory_space<vmem>>, %arg20: memref<1x32xf32, #tpu.memory_space<vmem>>, %arg21: memref<1x32xf32, #tpu.memory_space<vmem>>, %arg22: memref<1x32xf32, #tpu.memory_space<vmem>>, %arg23: memref<1x8x32xf32, #tpu.memory_space<vmem>>) attributes {dimension_semantics = [#tpu.dimension_semantics<parallel>], iteration_bounds = array<i64: 2>, scalar_prefetch = 0 : i64, scratch_operands = 0 : i64, tpu.core_type = #tpu.core_type<tc>, window_params = [{transform_indices = @transform_0, window_bounds = array<i64: 1, 8, 32>}, {transform_indices = @transform_1, window_bounds = array<i64: 1, 16, 64>}, {pipeline_mode = #tpu.pipeline_mode<synchronous>, transform_indices = @transform_2, window_bounds = array<i64: 32, 96>}, {pipeline_mode = #tpu.pipeline_mode<synchronous>, transform_indices = @transform_3, window_bounds = array<i64: 1, 96>}, {pipeline_mode = #tpu.pipeline_mode<synchronous>, transform_indices = @transform_4, window_bounds = array<i64: 32, 32>}, {pipeline_mode = #tpu.pipeline_mode<synchronous>, transform_indices = @transform_5, window_bounds = array<i64: 1, 32>}, {pipeline_mode = #tpu.pipeline_mode<synchronous>, transform_indices = @transform_6, window_bounds = array<i64: 1, 32>}, {pipeline_mode = #tpu.pipeline_mode<synchronous>, transform_indices = @transform_7, window_bounds = array<i64: 1, 32>}, {pipeline_mode = #tpu.pipeline_mode<synchronous>, transform_indices = @transform_8, window_bounds = array<i64: 32, 32>}, {pipeline_mode = #tpu.pipeline_mode<synchronous>, transform_indices = @transform_9, window_bounds = array<i64: 1, 32>}, {pipeline_mode = #tpu.pipeline_mode<synchronous>, transform_indices = @transform_10, window_bounds = array<i64: 64, 64>}, {pipeline_mode = #tpu.pipeline_mode<synchronous>, transform_indices = @transform_11, window_bounds = array<i64: 1, 64>}, {pipeline_mode = #tpu.pipeline_mode<synchronous>, transform_indices = @transform_12, window_bounds = array<i64: 32, 32>}, {pipeline_mode = #tpu.pipeline_mode<synchronous>, transform_indices = @transform_13, window_bounds = array<i64: 1, 32>}, {pipeline_mode = #tpu.pipeline_mode<synchronous>, transform_indices = @transform_14, window_bounds = array<i64: 1, 32>}, {pipeline_mode = #tpu.pipeline_mode<synchronous>, transform_indices = @transform_15, window_bounds = array<i64: 1, 32>}, {pipeline_mode = #tpu.pipeline_mode<synchronous>, transform_indices = @transform_16, window_bounds = array<i64: 32, 64>}, {pipeline_mode = #tpu.pipeline_mode<synchronous>, transform_indices = @transform_17, window_bounds = array<i64: 1, 64>}, {pipeline_mode = #tpu.pipeline_mode<synchronous>, transform_indices = @transform_18, window_bounds = array<i64: 64, 32>}, {pipeline_mode = #tpu.pipeline_mode<synchronous>, transform_indices = @transform_19, window_bounds = array<i64: 1, 32>}, {pipeline_mode = #tpu.pipeline_mode<synchronous>, transform_indices = @transform_20, window_bounds = array<i64: 1, 32>}, {pipeline_mode = #tpu.pipeline_mode<synchronous>, transform_indices = @transform_21, window_bounds = array<i64: 1, 32>}, {transform_indices = @transform_22, window_bounds = array<i64: 1, 8, 32>}]} {
    %c0 = arith.constant 0 : index
    %c0_0 = arith.constant 0 : index
    %c0_1 = arith.constant 0 : index
    %0 = vector.load %arg1[%c0, %c0_0, %c0_1] : memref<1x8x32xf32, #tpu.memory_space<vmem>>, vector<1x8x32xf32>
    %1 = vector.shape_cast %0 : vector<1x8x32xf32> to vector<8x32xf32>
    %2 = arith.truncf %1 : vector<8x32xf32> to vector<8x32xbf16>
    %c0_2 = arith.constant 0 : index
    %c0_3 = arith.constant 0 : index
    %3 = vector.load %arg3[%c0_2, %c0_3] : memref<32x96xbf16, #tpu.memory_space<vmem>>, vector<32x96xbf16>
    %cst = arith.constant dense<0.000000e+00> : vector<8x96xf32>
    %4 = tpu.matmul %2, %3, %cst {dimension_numbers = #tpu.dot_dimension_numbers<[1], [0], [0], [1], [0, 0, 1, 1], [], []>} : vector<8x32xbf16>, vector<32x96xbf16>, vector<8x96xf32> -> vector<8x96xf32>
    %c0_4 = arith.constant 0 : index
    %c0_5 = arith.constant 0 : index
    %5 = vector.load %arg4[%c0_4, %c0_5] : memref<1x96xf32, #tpu.memory_space<vmem>>, vector<1x96xf32>
    %6 = vector.broadcast %5 : vector<1x96xf32> to vector<8x96xf32>
    %7 = arith.addf %4, %6 : vector<8x96xf32>
    %8 = vector.extract_strided_slice %7 {offsets = [0, 0], sizes = [8, 32], strides = [1, 1]} : vector<8x96xf32> to vector<8x32xf32>
    %9 = arith.truncf %8 : vector<8x32xf32> to vector<8x32xbf16>
    %10 = vector.extract_strided_slice %7 {offsets = [0, 32], sizes = [8, 32], strides = [1, 1]} : vector<8x96xf32> to vector<8x32xf32>
    %11 = arith.truncf %10 : vector<8x32xf32> to vector<8x32xbf16>
    %12 = vector.extract_strided_slice %7 {offsets = [0, 64], sizes = [8, 32], strides = [1, 1]} : vector<8x96xf32> to vector<8x32xf32>
    %13 = arith.truncf %12 : vector<8x32xf32> to vector<8x32xbf16>
    %14 = tpu.iota {dimensions = array<i32: 0>} : vector<8x8xi32>
    %15 = tpu.iota {dimensions = array<i32: 1>} : vector<8x8xi32>
    %16 = arith.cmpi sgt, %15, %14 : vector<8x8xi32>
    %cst_6 = arith.constant -1.000000e+09 : f32
    %cst_7 = arith.constant 0.000000e+00 : f32
    %17 = vector.broadcast %cst_6 : f32 to vector<8x8xf32>
    %18 = vector.broadcast %cst_7 : f32 to vector<8x8xf32>
    %19 = arith.select %16, %17, %18 : vector<8x8xi1>, vector<8x8xf32>
    %c0_8 = arith.constant 0 : index
    %c0_9 = arith.constant 0 : index
    %20 = vector.load %arg5[%c0_8, %c0_9] : memref<32x32xbf16, #tpu.memory_space<vmem>>, vector<32x32xbf16>
    %c0_10 = arith.constant 0 : index
    %c0_11 = arith.constant 0 : index
    %21 = vector.load %arg6[%c0_10, %c0_11] : memref<1x32xf32, #tpu.memory_space<vmem>>, vector<1x32xf32>
    %22 = vector.shape_cast %21 : vector<1x32xf32> to vector<1x32xf32>
    %23 = vector.broadcast %22 : vector<1x32xf32> to vector<8x32xf32>
    %24 = vector.extract_strided_slice %9 {offsets = [0, 0], sizes = [8, 8], strides = [1, 1]} : vector<8x32xbf16> to vector<8x8xbf16>
    %25 = vector.extract_strided_slice %11 {offsets = [0, 0], sizes = [8, 8], strides = [1, 1]} : vector<8x32xbf16> to vector<8x8xbf16>
    %26 = vector.extract_strided_slice %13 {offsets = [0, 0], sizes = [8, 8], strides = [1, 1]} : vector<8x32xbf16> to vector<8x8xbf16>
    %cst_12 = arith.constant dense<0.000000e+00> : vector<8x8xf32>
    %27 = tpu.matmul %24, %25, %cst_12 {dimension_numbers = #tpu.dot_dimension_numbers<[1], [1], [0], [0], [0, 0, 1, 0], [], []>} : vector<8x8xbf16>, vector<8x8xbf16>, vector<8x8xf32> -> vector<8x8xf32>
    %28 = arith.addf %27, %19 : vector<8x8xf32>
    %cst_13 = arith.constant dense<0xFF800000> : vector<8xf32>
    %29 = vector.multi_reduction <maximumf>, %28, %cst_13 [1] : vector<8x8xf32> to vector<8xf32>
    %30 = vector.shape_cast %29 : vector<8xf32> to vector<8x1xf32>
    %31 = vector.broadcast %30 : vector<8x1xf32> to vector<8x8xf32>
    %32 = arith.subf %28, %31 : vector<8x8xf32>
    %33 = math.exp %32 : vector<8x8xf32>
    %cst_14 = arith.constant dense<0.000000e+00> : vector<8xf32>
    %34 = vector.multi_reduction <add>, %33, %cst_14 [1] : vector<8x8xf32> to vector<8xf32>
    %35 = vector.shape_cast %34 : vector<8xf32> to vector<8x1xf32>
    %36 = tpu.reciprocal %35 {approx = true} : vector<8x1xf32> -> vector<8x1xf32>
    %37 = vector.broadcast %36 : vector<8x1xf32> to vector<8x8xf32>
    %38 = arith.mulf %33, %37 : vector<8x8xf32>
    %39 = arith.truncf %38 : vector<8x8xf32> to vector<8x8xbf16>
    %cst_15 = arith.constant dense<0.000000e+00> : vector<8x8xf32>
    %40 = tpu.matmul %39, %26, %cst_15 {dimension_numbers = #tpu.dot_dimension_numbers<[1], [0], [0], [1], [0, 0, 1, 1], [], []>} : vector<8x8xbf16>, vector<8x8xbf16>, vector<8x8xf32> -> vector<8x8xf32>
    %41 = arith.truncf %40 : vector<8x8xf32> to vector<8x8xbf16>
    %42 = vector.extract_strided_slice %20 {offsets = [0, 0], sizes = [8, 32], strides = [1, 1]} : vector<32x32xbf16> to vector<8x32xbf16>
    %cst_16 = arith.constant dense<0.000000e+00> : vector<8x32xf32>
    %43 = tpu.matmul %41, %42, %cst_16 {dimension_numbers = #tpu.dot_dimension_numbers<[1], [0], [0], [1], [0, 0, 1, 1], [], []>} : vector<8x8xbf16>, vector<8x32xbf16>, vector<8x32xf32> -> vector<8x32xf32>
    %44 = arith.addf %23, %43 : vector<8x32xf32>
    %45 = vector.extract_strided_slice %9 {offsets = [0, 8], sizes = [8, 8], strides = [1, 1]} : vector<8x32xbf16> to vector<8x8xbf16>
    %46 = vector.extract_strided_slice %11 {offsets = [0, 8], sizes = [8, 8], strides = [1, 1]} : vector<8x32xbf16> to vector<8x8xbf16>
    %47 = vector.extract_strided_slice %13 {offsets = [0, 8], sizes = [8, 8], strides = [1, 1]} : vector<8x32xbf16> to vector<8x8xbf16>
    %cst_17 = arith.constant dense<0.000000e+00> : vector<8x8xf32>
    %48 = tpu.matmul %45, %46, %cst_17 {dimension_numbers = #tpu.dot_dimension_numbers<[1], [1], [0], [0], [0, 0, 1, 0], [], []>} : vector<8x8xbf16>, vector<8x8xbf16>, vector<8x8xf32> -> vector<8x8xf32>
    %49 = arith.addf %48, %19 : vector<8x8xf32>
    %cst_18 = arith.constant dense<0xFF800000> : vector<8xf32>
    %50 = vector.multi_reduction <maximumf>, %49, %cst_18 [1] : vector<8x8xf32> to vector<8xf32>
    %51 = vector.shape_cast %50 : vector<8xf32> to vector<8x1xf32>
    %52 = vector.broadcast %51 : vector<8x1xf32> to vector<8x8xf32>
    %53 = arith.subf %49, %52 : vector<8x8xf32>
    %54 = math.exp %53 : vector<8x8xf32>
    %cst_19 = arith.constant dense<0.000000e+00> : vector<8xf32>
    %55 = vector.multi_reduction <add>, %54, %cst_19 [1] : vector<8x8xf32> to vector<8xf32>
    %56 = vector.shape_cast %55 : vector<8xf32> to vector<8x1xf32>
    %57 = tpu.reciprocal %56 {approx = true} : vector<8x1xf32> -> vector<8x1xf32>
    %58 = vector.broadcast %57 : vector<8x1xf32> to vector<8x8xf32>
    %59 = arith.mulf %54, %58 : vector<8x8xf32>
    %60 = arith.truncf %59 : vector<8x8xf32> to vector<8x8xbf16>
    %cst_20 = arith.constant dense<0.000000e+00> : vector<8x8xf32>
    %61 = tpu.matmul %60, %47, %cst_20 {dimension_numbers = #tpu.dot_dimension_numbers<[1], [0], [0], [1], [0, 0, 1, 1], [], []>} : vector<8x8xbf16>, vector<8x8xbf16>, vector<8x8xf32> -> vector<8x8xf32>
    %62 = arith.truncf %61 : vector<8x8xf32> to vector<8x8xbf16>
    %63 = vector.extract_strided_slice %20 {offsets = [8, 0], sizes = [8, 32], strides = [1, 1]} : vector<32x32xbf16> to vector<8x32xbf16>
    %cst_21 = arith.constant dense<0.000000e+00> : vector<8x32xf32>
    %64 = tpu.matmul %62, %63, %cst_21 {dimension_numbers = #tpu.dot_dimension_numbers<[1], [0], [0], [1], [0, 0, 1, 1], [], []>} : vector<8x8xbf16>, vector<8x32xbf16>, vector<8x32xf32> -> vector<8x32xf32>
    %65 = arith.addf %44, %64 : vector<8x32xf32>
    %66 = vector.extract_strided_slice %9 {offsets = [0, 16], sizes = [8, 8], strides = [1, 1]} : vector<8x32xbf16> to vector<8x8xbf16>
    %67 = vector.extract_strided_slice %11 {offsets = [0, 16], sizes = [8, 8], strides = [1, 1]} : vector<8x32xbf16> to vector<8x8xbf16>
    %68 = vector.extract_strided_slice %13 {offsets = [0, 16], sizes = [8, 8], strides = [1, 1]} : vector<8x32xbf16> to vector<8x8xbf16>
    %cst_22 = arith.constant dense<0.000000e+00> : vector<8x8xf32>
    %69 = tpu.matmul %66, %67, %cst_22 {dimension_numbers = #tpu.dot_dimension_numbers<[1], [1], [0], [0], [0, 0, 1, 0], [], []>} : vector<8x8xbf16>, vector<8x8xbf16>, vector<8x8xf32> -> vector<8x8xf32>
    %70 = arith.addf %69, %19 : vector<8x8xf32>
    %cst_23 = arith.constant dense<0xFF800000> : vector<8xf32>
    %71 = vector.multi_reduction <maximumf>, %70, %cst_23 [1] : vector<8x8xf32> to vector<8xf32>
    %72 = vector.shape_cast %71 : vector<8xf32> to vector<8x1xf32>
    %73 = vector.broadcast %72 : vector<8x1xf32> to vector<8x8xf32>
    %74 = arith.subf %70, %73 : vector<8x8xf32>
    %75 = math.exp %74 : vector<8x8xf32>
    %cst_24 = arith.constant dense<0.000000e+00> : vector<8xf32>
    %76 = vector.multi_reduction <add>, %75, %cst_24 [1] : vector<8x8xf32> to vector<8xf32>
    %77 = vector.shape_cast %76 : vector<8xf32> to vector<8x1xf32>
    %78 = tpu.reciprocal %77 {approx = true} : vector<8x1xf32> -> vector<8x1xf32>
    %79 = vector.broadcast %78 : vector<8x1xf32> to vector<8x8xf32>
    %80 = arith.mulf %75, %79 : vector<8x8xf32>
    %81 = arith.truncf %80 : vector<8x8xf32> to vector<8x8xbf16>
    %cst_25 = arith.constant dense<0.000000e+00> : vector<8x8xf32>
    %82 = tpu.matmul %81, %68, %cst_25 {dimension_numbers = #tpu.dot_dimension_numbers<[1], [0], [0], [1], [0, 0, 1, 1], [], []>} : vector<8x8xbf16>, vector<8x8xbf16>, vector<8x8xf32> -> vector<8x8xf32>
    %83 = arith.truncf %82 : vector<8x8xf32> to vector<8x8xbf16>
    %84 = vector.extract_strided_slice %20 {offsets = [16, 0], sizes = [8, 32], strides = [1, 1]} : vector<32x32xbf16> to vector<8x32xbf16>
    %cst_26 = arith.constant dense<0.000000e+00> : vector<8x32xf32>
    %85 = tpu.matmul %83, %84, %cst_26 {dimension_numbers = #tpu.dot_dimension_numbers<[1], [0], [0], [1], [0, 0, 1, 1], [], []>} : vector<8x8xbf16>, vector<8x32xbf16>, vector<8x32xf32> -> vector<8x32xf32>
    %86 = arith.addf %65, %85 : vector<8x32xf32>
    %87 = vector.extract_strided_slice %9 {offsets = [0, 24], sizes = [8, 8], strides = [1, 1]} : vector<8x32xbf16> to vector<8x8xbf16>
    %88 = vector.extract_strided_slice %11 {offsets = [0, 24], sizes = [8, 8], strides = [1, 1]} : vector<8x32xbf16> to vector<8x8xbf16>
    %89 = vector.extract_strided_slice %13 {offsets = [0, 24], sizes = [8, 8], strides = [1, 1]} : vector<8x32xbf16> to vector<8x8xbf16>
    %cst_27 = arith.constant dense<0.000000e+00> : vector<8x8xf32>
    %90 = tpu.matmul %87, %88, %cst_27 {dimension_numbers = #tpu.dot_dimension_numbers<[1], [1], [0], [0], [0, 0, 1, 0], [], []>} : vector<8x8xbf16>, vector<8x8xbf16>, vector<8x8xf32> -> vector<8x8xf32>
    %91 = arith.addf %90, %19 : vector<8x8xf32>
    %cst_28 = arith.constant dense<0xFF800000> : vector<8xf32>
    %92 = vector.multi_reduction <maximumf>, %91, %cst_28 [1] : vector<8x8xf32> to vector<8xf32>
    %93 = vector.shape_cast %92 : vector<8xf32> to vector<8x1xf32>
    %94 = vector.broadcast %93 : vector<8x1xf32> to vector<8x8xf32>
    %95 = arith.subf %91, %94 : vector<8x8xf32>
    %96 = math.exp %95 : vector<8x8xf32>
    %cst_29 = arith.constant dense<0.000000e+00> : vector<8xf32>
    %97 = vector.multi_reduction <add>, %96, %cst_29 [1] : vector<8x8xf32> to vector<8xf32>
    %98 = vector.shape_cast %97 : vector<8xf32> to vector<8x1xf32>
    %99 = tpu.reciprocal %98 {approx = true} : vector<8x1xf32> -> vector<8x1xf32>
    %100 = vector.broadcast %99 : vector<8x1xf32> to vector<8x8xf32>
    %101 = arith.mulf %96, %100 : vector<8x8xf32>
    %102 = arith.truncf %101 : vector<8x8xf32> to vector<8x8xbf16>
    %cst_30 = arith.constant dense<0.000000e+00> : vector<8x8xf32>
    %103 = tpu.matmul %102, %89, %cst_30 {dimension_numbers = #tpu.dot_dimension_numbers<[1], [0], [0], [1], [0, 0, 1, 1], [], []>} : vector<8x8xbf16>, vector<8x8xbf16>, vector<8x8xf32> -> vector<8x8xf32>
    %104 = arith.truncf %103 : vector<8x8xf32> to vector<8x8xbf16>
    %105 = vector.extract_strided_slice %20 {offsets = [24, 0], sizes = [8, 32], strides = [1, 1]} : vector<32x32xbf16> to vector<8x32xbf16>
    %cst_31 = arith.constant dense<0.000000e+00> : vector<8x32xf32>
    %106 = tpu.matmul %104, %105, %cst_31 {dimension_numbers = #tpu.dot_dimension_numbers<[1], [0], [0], [1], [0, 0, 1, 1], [], []>} : vector<8x8xbf16>, vector<8x32xbf16>, vector<8x32xf32> -> vector<8x32xf32>
    %107 = arith.addf %86, %106 : vector<8x32xf32>
    %108 = arith.addf %107, %1 : vector<8x32xf32>
    %c0_32 = arith.constant 0 : index
    %c0_33 = arith.constant 0 : index
    %109 = vector.load %arg7[%c0_32, %c0_33] : memref<1x32xf32, #tpu.memory_space<vmem>>, vector<1x32xf32>
    %c0_34 = arith.constant 0 : index
    %c0_35 = arith.constant 0 : index
    %110 = vector.load %arg8[%c0_34, %c0_35] : memref<1x32xf32, #tpu.memory_space<vmem>>, vector<1x32xf32>
    %cst_36 = arith.constant dense<0.000000e+00> : vector<8xf32>
    %111 = vector.multi_reduction <add>, %108, %cst_36 [1] : vector<8x32xf32> to vector<8xf32>
    %112 = vector.shape_cast %111 : vector<8xf32> to vector<8x1xf32>
    %cst_37 = arith.constant 3.200000e+01 : f32
    %113 = vector.broadcast %cst_37 : f32 to vector<8x1xf32>
    %114 = arith.divf %112, %113 : vector<8x1xf32>
    %115 = vector.broadcast %114 : vector<8x1xf32> to vector<8x32xf32>
    %116 = arith.subf %108, %115 : vector<8x32xf32>
    %117 = arith.mulf %116, %116 : vector<8x32xf32>
    %cst_38 = arith.constant dense<0.000000e+00> : vector<8xf32>
    %118 = vector.multi_reduction <add>, %117, %cst_38 [1] : vector<8x32xf32> to vector<8xf32>
    %119 = vector.shape_cast %118 : vector<8xf32> to vector<8x1xf32>
    %cst_39 = arith.constant 3.200000e+01 : f32
    %120 = vector.broadcast %cst_39 : f32 to vector<8x1xf32>
    %121 = arith.divf %119, %120 : vector<8x1xf32>
    %122 = vector.broadcast %114 : vector<8x1xf32> to vector<8x32xf32>
    %123 = arith.subf %108, %122 : vector<8x32xf32>
    %cst_40 = arith.constant 9.99999974E-6 : f32
    %124 = vector.broadcast %cst_40 : f32 to vector<8x1xf32>
    %125 = arith.addf %121, %124 : vector<8x1xf32>
    %126 = math.rsqrt %125 : vector<8x1xf32>
    %127 = vector.broadcast %126 : vector<8x1xf32> to vector<8x32xf32>
    %128 = arith.mulf %123, %127 : vector<8x32xf32>
    %129 = vector.broadcast %109 : vector<1x32xf32> to vector<8x32xf32>
    %130 = arith.mulf %128, %129 : vector<8x32xf32>
    %131 = vector.broadcast %110 : vector<1x32xf32> to vector<8x32xf32>
    %132 = arith.addf %130, %131 : vector<8x32xf32>
    %c0_41 = arith.constant 0 : index
    %c0_42 = arith.constant 0 : index
    %c0_43 = arith.constant 0 : index
    %133 = vector.load %arg2[%c0_41, %c0_42, %c0_43] : memref<1x16x64xf32, #tpu.memory_space<vmem>>, vector<1x16x64xf32>
    %134 = vector.shape_cast %133 : vector<1x16x64xf32> to vector<16x64xf32>
    %135 = arith.truncf %134 : vector<16x64xf32> to vector<16x64xbf16>
    %136 = arith.truncf %107 : vector<8x32xf32> to vector<8x32xbf16>
    %c0_44 = arith.constant 0 : index
    %c0_45 = arith.constant 0 : index
    %137 = vector.load %arg9[%c0_44, %c0_45] : memref<32x32xbf16, #tpu.memory_space<vmem>>, vector<32x32xbf16>
    %cst_46 = arith.constant dense<0.000000e+00> : vector<8x32xf32>
    %138 = tpu.matmul %136, %137, %cst_46 {dimension_numbers = #tpu.dot_dimension_numbers<[1], [0], [0], [1], [0, 0, 1, 1], [], []>} : vector<8x32xbf16>, vector<32x32xbf16>, vector<8x32xf32> -> vector<8x32xf32>
    %c0_47 = arith.constant 0 : index
    %c0_48 = arith.constant 0 : index
    %139 = vector.load %arg10[%c0_47, %c0_48] : memref<1x32xf32, #tpu.memory_space<vmem>>, vector<1x32xf32>
    %140 = vector.broadcast %139 : vector<1x32xf32> to vector<8x32xf32>
    %141 = arith.addf %138, %140 : vector<8x32xf32>
    %142 = arith.truncf %141 : vector<8x32xf32> to vector<8x32xbf16>
    %c0_49 = arith.constant 0 : index
    %c0_50 = arith.constant 0 : index
    %143 = vector.load %arg11[%c0_49, %c0_50] : memref<64x64xbf16, #tpu.memory_space<vmem>>, vector<64x64xbf16>
    %cst_51 = arith.constant dense<0.000000e+00> : vector<16x64xf32>
    %144 = tpu.matmul %135, %143, %cst_51 {dimension_numbers = #tpu.dot_dimension_numbers<[1], [0], [0], [1], [0, 0, 1, 1], [], []>} : vector<16x64xbf16>, vector<64x64xbf16>, vector<16x64xf32> -> vector<16x64xf32>
    %c0_52 = arith.constant 0 : index
    %c0_53 = arith.constant 0 : index
    %145 = vector.load %arg12[%c0_52, %c0_53] : memref<1x64xf32, #tpu.memory_space<vmem>>, vector<1x64xf32>
    %146 = vector.broadcast %145 : vector<1x64xf32> to vector<16x64xf32>
    %147 = arith.addf %144, %146 : vector<16x64xf32>
    %148 = vector.extract_strided_slice %147 {offsets = [0, 0], sizes = [16, 32], strides = [1, 1]} : vector<16x64xf32> to vector<16x32xf32>
    %149 = arith.truncf %148 : vector<16x32xf32> to vector<16x32xbf16>
    %150 = vector.extract_strided_slice %147 {offsets = [0, 32], sizes = [16, 32], strides = [1, 1]} : vector<16x64xf32> to vector<16x32xf32>
    %151 = arith.truncf %150 : vector<16x32xf32> to vector<16x32xbf16>
    %c0_54 = arith.constant 0 : index
    %c0_55 = arith.constant 0 : index
    %152 = vector.load %arg13[%c0_54, %c0_55] : memref<32x32xbf16, #tpu.memory_space<vmem>>, vector<32x32xbf16>
    %c0_56 = arith.constant 0 : index
    %c0_57 = arith.constant 0 : index
    %153 = vector.load %arg14[%c0_56, %c0_57] : memref<1x32xf32, #tpu.memory_space<vmem>>, vector<1x32xf32>
    %154 = vector.shape_cast %153 : vector<1x32xf32> to vector<1x32xf32>
    %155 = vector.broadcast %154 : vector<1x32xf32> to vector<8x32xf32>
    %156 = vector.extract_strided_slice %142 {offsets = [0, 0], sizes = [8, 8], strides = [1, 1]} : vector<8x32xbf16> to vector<8x8xbf16>
    %157 = vector.extract_strided_slice %149 {offsets = [0, 0], sizes = [16, 8], strides = [1, 1]} : vector<16x32xbf16> to vector<16x8xbf16>
    %158 = vector.extract_strided_slice %151 {offsets = [0, 0], sizes = [16, 8], strides = [1, 1]} : vector<16x32xbf16> to vector<16x8xbf16>
    %cst_58 = arith.constant dense<0.000000e+00> : vector<8x16xf32>
    %159 = tpu.matmul %156, %157, %cst_58 {dimension_numbers = #tpu.dot_dimension_numbers<[1], [1], [0], [0], [0, 0, 1, 0], [], []>} : vector<8x8xbf16>, vector<16x8xbf16>, vector<8x16xf32> -> vector<8x16xf32>
    %cst_59 = arith.constant dense<0xFF800000> : vector<8xf32>
    %160 = vector.multi_reduction <maximumf>, %159, %cst_59 [1] : vector<8x16xf32> to vector<8xf32>
    %161 = vector.shape_cast %160 : vector<8xf32> to vector<8x1xf32>
    %162 = vector.broadcast %161 : vector<8x1xf32> to vector<8x16xf32>
    %163 = arith.subf %159, %162 : vector<8x16xf32>
    %164 = math.exp %163 : vector<8x16xf32>
    %cst_60 = arith.constant dense<0.000000e+00> : vector<8xf32>
    %165 = vector.multi_reduction <add>, %164, %cst_60 [1] : vector<8x16xf32> to vector<8xf32>
    %166 = vector.shape_cast %165 : vector<8xf32> to vector<8x1xf32>
    %167 = tpu.reciprocal %166 {approx = true} : vector<8x1xf32> -> vector<8x1xf32>
    %168 = vector.broadcast %167 : vector<8x1xf32> to vector<8x16xf32>
    %169 = arith.mulf %164, %168 : vector<8x16xf32>
    %170 = arith.truncf %169 : vector<8x16xf32> to vector<8x16xbf16>
    %cst_61 = arith.constant dense<0.000000e+00> : vector<8x8xf32>
    %171 = tpu.matmul %170, %158, %cst_61 {dimension_numbers = #tpu.dot_dimension_numbers<[1], [0], [0], [1], [0, 0, 1, 1], [], []>} : vector<8x16xbf16>, vector<16x8xbf16>, vector<8x8xf32> -> vector<8x8xf32>
    %172 = arith.truncf %171 : vector<8x8xf32> to vector<8x8xbf16>
    %173 = vector.extract_strided_slice %152 {offsets = [0, 0], sizes = [8, 32], strides = [1, 1]} : vector<32x32xbf16> to vector<8x32xbf16>
    %cst_62 = arith.constant dense<0.000000e+00> : vector<8x32xf32>
    %174 = tpu.matmul %172, %173, %cst_62 {dimension_numbers = #tpu.dot_dimension_numbers<[1], [0], [0], [1], [0, 0, 1, 1], [], []>} : vector<8x8xbf16>, vector<8x32xbf16>, vector<8x32xf32> -> vector<8x32xf32>
    %175 = arith.addf %155, %174 : vector<8x32xf32>
    %176 = vector.extract_strided_slice %142 {offsets = [0, 8], sizes = [8, 8], strides = [1, 1]} : vector<8x32xbf16> to vector<8x8xbf16>
    %177 = vector.extract_strided_slice %149 {offsets = [0, 8], sizes = [16, 8], strides = [1, 1]} : vector<16x32xbf16> to vector<16x8xbf16>
    %178 = vector.extract_strided_slice %151 {offsets = [0, 8], sizes = [16, 8], strides = [1, 1]} : vector<16x32xbf16> to vector<16x8xbf16>
    %cst_63 = arith.constant dense<0.000000e+00> : vector<8x16xf32>
    %179 = tpu.matmul %176, %177, %cst_63 {dimension_numbers = #tpu.dot_dimension_numbers<[1], [1], [0], [0], [0, 0, 1, 0], [], []>} : vector<8x8xbf16>, vector<16x8xbf16>, vector<8x16xf32> -> vector<8x16xf32>
    %cst_64 = arith.constant dense<0xFF800000> : vector<8xf32>
    %180 = vector.multi_reduction <maximumf>, %179, %cst_64 [1] : vector<8x16xf32> to vector<8xf32>
    %181 = vector.shape_cast %180 : vector<8xf32> to vector<8x1xf32>
    %182 = vector.broadcast %181 : vector<8x1xf32> to vector<8x16xf32>
    %183 = arith.subf %179, %182 : vector<8x16xf32>
    %184 = math.exp %183 : vector<8x16xf32>
    %cst_65 = arith.constant dense<0.000000e+00> : vector<8xf32>
    %185 = vector.multi_reduction <add>, %184, %cst_65 [1] : vector<8x16xf32> to vector<8xf32>
    %186 = vector.shape_cast %185 : vector<8xf32> to vector<8x1xf32>
    %187 = tpu.reciprocal %186 {approx = true} : vector<8x1xf32> -> vector<8x1xf32>
    %188 = vector.broadcast %187 : vector<8x1xf32> to vector<8x16xf32>
    %189 = arith.mulf %184, %188 : vector<8x16xf32>
    %190 = arith.truncf %189 : vector<8x16xf32> to vector<8x16xbf16>
    %cst_66 = arith.constant dense<0.000000e+00> : vector<8x8xf32>
    %191 = tpu.matmul %190, %178, %cst_66 {dimension_numbers = #tpu.dot_dimension_numbers<[1], [0], [0], [1], [0, 0, 1, 1], [], []>} : vector<8x16xbf16>, vector<16x8xbf16>, vector<8x8xf32> -> vector<8x8xf32>
    %192 = arith.truncf %191 : vector<8x8xf32> to vector<8x8xbf16>
    %193 = vector.extract_strided_slice %152 {offsets = [8, 0], sizes = [8, 32], strides = [1, 1]} : vector<32x32xbf16> to vector<8x32xbf16>
    %cst_67 = arith.constant dense<0.000000e+00> : vector<8x32xf32>
    %194 = tpu.matmul %192, %193, %cst_67 {dimension_numbers = #tpu.dot_dimension_numbers<[1], [0], [0], [1], [0, 0, 1, 1], [], []>} : vector<8x8xbf16>, vector<8x32xbf16>, vector<8x32xf32> -> vector<8x32xf32>
    %195 = arith.addf %175, %194 : vector<8x32xf32>
    %196 = vector.extract_strided_slice %142 {offsets = [0, 16], sizes = [8, 8], strides = [1, 1]} : vector<8x32xbf16> to vector<8x8xbf16>
    %197 = vector.extract_strided_slice %149 {offsets = [0, 16], sizes = [16, 8], strides = [1, 1]} : vector<16x32xbf16> to vector<16x8xbf16>
    %198 = vector.extract_strided_slice %151 {offsets = [0, 16], sizes = [16, 8], strides = [1, 1]} : vector<16x32xbf16> to vector<16x8xbf16>
    %cst_68 = arith.constant dense<0.000000e+00> : vector<8x16xf32>
    %199 = tpu.matmul %196, %197, %cst_68 {dimension_numbers = #tpu.dot_dimension_numbers<[1], [1], [0], [0], [0, 0, 1, 0], [], []>} : vector<8x8xbf16>, vector<16x8xbf16>, vector<8x16xf32> -> vector<8x16xf32>
    %cst_69 = arith.constant dense<0xFF800000> : vector<8xf32>
    %200 = vector.multi_reduction <maximumf>, %199, %cst_69 [1] : vector<8x16xf32> to vector<8xf32>
    %201 = vector.shape_cast %200 : vector<8xf32> to vector<8x1xf32>
    %202 = vector.broadcast %201 : vector<8x1xf32> to vector<8x16xf32>
    %203 = arith.subf %199, %202 : vector<8x16xf32>
    %204 = math.exp %203 : vector<8x16xf32>
    %cst_70 = arith.constant dense<0.000000e+00> : vector<8xf32>
    %205 = vector.multi_reduction <add>, %204, %cst_70 [1] : vector<8x16xf32> to vector<8xf32>
    %206 = vector.shape_cast %205 : vector<8xf32> to vector<8x1xf32>
    %207 = tpu.reciprocal %206 {approx = true} : vector<8x1xf32> -> vector<8x1xf32>
    %208 = vector.broadcast %207 : vector<8x1xf32> to vector<8x16xf32>
    %209 = arith.mulf %204, %208 : vector<8x16xf32>
    %210 = arith.truncf %209 : vector<8x16xf32> to vector<8x16xbf16>
    %cst_71 = arith.constant dense<0.000000e+00> : vector<8x8xf32>
    %211 = tpu.matmul %210, %198, %cst_71 {dimension_numbers = #tpu.dot_dimension_numbers<[1], [0], [0], [1], [0, 0, 1, 1], [], []>} : vector<8x16xbf16>, vector<16x8xbf16>, vector<8x8xf32> -> vector<8x8xf32>
    %212 = arith.truncf %211 : vector<8x8xf32> to vector<8x8xbf16>
    %213 = vector.extract_strided_slice %152 {offsets = [16, 0], sizes = [8, 32], strides = [1, 1]} : vector<32x32xbf16> to vector<8x32xbf16>
    %cst_72 = arith.constant dense<0.000000e+00> : vector<8x32xf32>
    %214 = tpu.matmul %212, %213, %cst_72 {dimension_numbers = #tpu.dot_dimension_numbers<[1], [0], [0], [1], [0, 0, 1, 1], [], []>} : vector<8x8xbf16>, vector<8x32xbf16>, vector<8x32xf32> -> vector<8x32xf32>
    %215 = arith.addf %195, %214 : vector<8x32xf32>
    %216 = vector.extract_strided_slice %142 {offsets = [0, 24], sizes = [8, 8], strides = [1, 1]} : vector<8x32xbf16> to vector<8x8xbf16>
    %217 = vector.extract_strided_slice %149 {offsets = [0, 24], sizes = [16, 8], strides = [1, 1]} : vector<16x32xbf16> to vector<16x8xbf16>
    %218 = vector.extract_strided_slice %151 {offsets = [0, 24], sizes = [16, 8], strides = [1, 1]} : vector<16x32xbf16> to vector<16x8xbf16>
    %cst_73 = arith.constant dense<0.000000e+00> : vector<8x16xf32>
    %219 = tpu.matmul %216, %217, %cst_73 {dimension_numbers = #tpu.dot_dimension_numbers<[1], [1], [0], [0], [0, 0, 1, 0], [], []>} : vector<8x8xbf16>, vector<16x8xbf16>, vector<8x16xf32> -> vector<8x16xf32>
    %cst_74 = arith.constant dense<0xFF800000> : vector<8xf32>
    %220 = vector.multi_reduction <maximumf>, %219, %cst_74 [1] : vector<8x16xf32> to vector<8xf32>
    %221 = vector.shape_cast %220 : vector<8xf32> to vector<8x1xf32>
    %222 = vector.broadcast %221 : vector<8x1xf32> to vector<8x16xf32>
    %223 = arith.subf %219, %222 : vector<8x16xf32>
    %224 = math.exp %223 : vector<8x16xf32>
    %cst_75 = arith.constant dense<0.000000e+00> : vector<8xf32>
    %225 = vector.multi_reduction <add>, %224, %cst_75 [1] : vector<8x16xf32> to vector<8xf32>
    %226 = vector.shape_cast %225 : vector<8xf32> to vector<8x1xf32>
    %227 = tpu.reciprocal %226 {approx = true} : vector<8x1xf32> -> vector<8x1xf32>
    %228 = vector.broadcast %227 : vector<8x1xf32> to vector<8x16xf32>
    %229 = arith.mulf %224, %228 : vector<8x16xf32>
    %230 = arith.truncf %229 : vector<8x16xf32> to vector<8x16xbf16>
    %cst_76 = arith.constant dense<0.000000e+00> : vector<8x8xf32>
    %231 = tpu.matmul %230, %218, %cst_76 {dimension_numbers = #tpu.dot_dimension_numbers<[1], [0], [0], [1], [0, 0, 1, 1], [], []>} : vector<8x16xbf16>, vector<16x8xbf16>, vector<8x8xf32> -> vector<8x8xf32>
    %232 = arith.truncf %231 : vector<8x8xf32> to vector<8x8xbf16>
    %233 = vector.extract_strided_slice %152 {offsets = [24, 0], sizes = [8, 32], strides = [1, 1]} : vector<32x32xbf16> to vector<8x32xbf16>
    %cst_77 = arith.constant dense<0.000000e+00> : vector<8x32xf32>
    %234 = tpu.matmul %232, %233, %cst_77 {dimension_numbers = #tpu.dot_dimension_numbers<[1], [0], [0], [1], [0, 0, 1, 1], [], []>} : vector<8x8xbf16>, vector<8x32xbf16>, vector<8x32xf32> -> vector<8x32xf32>
    %235 = arith.addf %215, %234 : vector<8x32xf32>
    %236 = arith.addf %235, %132 : vector<8x32xf32>
    %c0_78 = arith.constant 0 : index
    %c0_79 = arith.constant 0 : index
    %237 = vector.load %arg15[%c0_78, %c0_79] : memref<1x32xf32, #tpu.memory_space<vmem>>, vector<1x32xf32>
    %c0_80 = arith.constant 0 : index
    %c0_81 = arith.constant 0 : index
    %238 = vector.load %arg16[%c0_80, %c0_81] : memref<1x32xf32, #tpu.memory_space<vmem>>, vector<1x32xf32>
    %cst_82 = arith.constant dense<0.000000e+00> : vector<8xf32>
    %239 = vector.multi_reduction <add>, %236, %cst_82 [1] : vector<8x32xf32> to vector<8xf32>
    %240 = vector.shape_cast %239 : vector<8xf32> to vector<8x1xf32>
    %cst_83 = arith.constant 3.200000e+01 : f32
    %241 = vector.broadcast %cst_83 : f32 to vector<8x1xf32>
    %242 = arith.divf %240, %241 : vector<8x1xf32>
    %243 = vector.broadcast %242 : vector<8x1xf32> to vector<8x32xf32>
    %244 = arith.subf %236, %243 : vector<8x32xf32>
    %245 = arith.mulf %244, %244 : vector<8x32xf32>
    %cst_84 = arith.constant dense<0.000000e+00> : vector<8xf32>
    %246 = vector.multi_reduction <add>, %245, %cst_84 [1] : vector<8x32xf32> to vector<8xf32>
    %247 = vector.shape_cast %246 : vector<8xf32> to vector<8x1xf32>
    %cst_85 = arith.constant 3.200000e+01 : f32
    %248 = vector.broadcast %cst_85 : f32 to vector<8x1xf32>
    %249 = arith.divf %247, %248 : vector<8x1xf32>
    %250 = vector.broadcast %242 : vector<8x1xf32> to vector<8x32xf32>
    %251 = arith.subf %236, %250 : vector<8x32xf32>
    %cst_86 = arith.constant 9.99999974E-6 : f32
    %252 = vector.broadcast %cst_86 : f32 to vector<8x1xf32>
    %253 = arith.addf %249, %252 : vector<8x1xf32>
    %254 = math.rsqrt %253 : vector<8x1xf32>
    %255 = vector.broadcast %254 : vector<8x1xf32> to vector<8x32xf32>
    %256 = arith.mulf %251, %255 : vector<8x32xf32>
    %257 = vector.broadcast %237 : vector<1x32xf32> to vector<8x32xf32>
    %258 = arith.mulf %256, %257 : vector<8x32xf32>
    %259 = vector.broadcast %238 : vector<1x32xf32> to vector<8x32xf32>
    %260 = arith.addf %258, %259 : vector<8x32xf32>
    %261 = arith.truncf %260 : vector<8x32xf32> to vector<8x32xbf16>
    %c0_87 = arith.constant 0 : index
    %c0_88 = arith.constant 0 : index
    %262 = vector.load %arg17[%c0_87, %c0_88] : memref<32x64xbf16, #tpu.memory_space<vmem>>, vector<32x64xbf16>
    %cst_89 = arith.constant dense<0.000000e+00> : vector<8x64xf32>
    %263 = tpu.matmul %261, %262, %cst_89 {dimension_numbers = #tpu.dot_dimension_numbers<[1], [0], [0], [1], [0, 0, 1, 1], [], []>} : vector<8x32xbf16>, vector<32x64xbf16>, vector<8x64xf32> -> vector<8x64xf32>
    %c0_90 = arith.constant 0 : index
    %c0_91 = arith.constant 0 : index
    %264 = vector.load %arg18[%c0_90, %c0_91] : memref<1x64xf32, #tpu.memory_space<vmem>>, vector<1x64xf32>
    %265 = vector.broadcast %264 : vector<1x64xf32> to vector<8x64xf32>
    %266 = arith.addf %263, %265 : vector<8x64xf32>
    %cst_92 = arith.constant 0.000000e+00 : f32
    %267 = vector.broadcast %cst_92 : f32 to vector<8x64xf32>
    %268 = arith.maximumf %266, %267 : vector<8x64xf32>
    %269 = arith.truncf %268 : vector<8x64xf32> to vector<8x64xbf16>
    %c0_93 = arith.constant 0 : index
    %c0_94 = arith.constant 0 : index
    %270 = vector.load %arg19[%c0_93, %c0_94] : memref<64x32xbf16, #tpu.memory_space<vmem>>, vector<64x32xbf16>
    %cst_95 = arith.constant dense<0.000000e+00> : vector<8x32xf32>
    %271 = tpu.matmul %269, %270, %cst_95 {dimension_numbers = #tpu.dot_dimension_numbers<[1], [0], [0], [1], [0, 0, 1, 1], [], []>} : vector<8x64xbf16>, vector<64x32xbf16>, vector<8x32xf32> -> vector<8x32xf32>
    %c0_96 = arith.constant 0 : index
    %c0_97 = arith.constant 0 : index
    %272 = vector.load %arg20[%c0_96, %c0_97] : memref<1x32xf32, #tpu.memory_space<vmem>>, vector<1x32xf32>
    %273 = vector.broadcast %272 : vector<1x32xf32> to vector<8x32xf32>
    %274 = arith.addf %271, %273 : vector<8x32xf32>
    %275 = arith.addf %274, %260 : vector<8x32xf32>
    %c0_98 = arith.constant 0 : index
    %c0_99 = arith.constant 0 : index
    %276 = vector.load %arg21[%c0_98, %c0_99] : memref<1x32xf32, #tpu.memory_space<vmem>>, vector<1x32xf32>
    %c0_100 = arith.constant 0 : index
    %c0_101 = arith.constant 0 : index
    %277 = vector.load %arg22[%c0_100, %c0_101] : memref<1x32xf32, #tpu.memory_space<vmem>>, vector<1x32xf32>
    %cst_102 = arith.constant dense<0.000000e+00> : vector<8xf32>
    %278 = vector.multi_reduction <add>, %275, %cst_102 [1] : vector<8x32xf32> to vector<8xf32>
    %279 = vector.shape_cast %278 : vector<8xf32> to vector<8x1xf32>
    %cst_103 = arith.constant 3.200000e+01 : f32
    %280 = vector.broadcast %cst_103 : f32 to vector<8x1xf32>
    %281 = arith.divf %279, %280 : vector<8x1xf32>
    %282 = vector.broadcast %281 : vector<8x1xf32> to vector<8x32xf32>
    %283 = arith.subf %275, %282 : vector<8x32xf32>
    %284 = arith.mulf %283, %283 : vector<8x32xf32>
    %cst_104 = arith.constant dense<0.000000e+00> : vector<8xf32>
    %285 = vector.multi_reduction <add>, %284, %cst_104 [1] : vector<8x32xf32> to vector<8xf32>
    %286 = vector.shape_cast %285 : vector<8xf32> to vector<8x1xf32>
    %cst_105 = arith.constant 3.200000e+01 : f32
    %287 = vector.broadcast %cst_105 : f32 to vector<8x1xf32>
    %288 = arith.divf %286, %287 : vector<8x1xf32>
    %289 = vector.broadcast %281 : vector<8x1xf32> to vector<8x32xf32>
    %290 = arith.subf %275, %289 : vector<8x32xf32>
    %cst_106 = arith.constant 9.99999974E-6 : f32
    %291 = vector.broadcast %cst_106 : f32 to vector<8x1xf32>
    %292 = arith.addf %288, %291 : vector<8x1xf32>
    %293 = math.rsqrt %292 : vector<8x1xf32>
    %294 = vector.broadcast %293 : vector<8x1xf32> to vector<8x32xf32>
    %295 = arith.mulf %290, %294 : vector<8x32xf32>
    %296 = vector.broadcast %276 : vector<1x32xf32> to vector<8x32xf32>
    %297 = arith.mulf %295, %296 : vector<8x32xf32>
    %298 = vector.broadcast %277 : vector<1x32xf32> to vector<8x32xf32>
    %299 = arith.addf %297, %298 : vector<8x32xf32>
    %c0_107 = arith.constant 0 : index
    %c0_108 = arith.constant 0 : index
    %c0_109 = arith.constant 0 : index
    %300 = vector.load %arg23[%c0_107, %c0_108, %c0_109] : memref<1x8x32xf32, #tpu.memory_space<vmem>>, vector<1x8x32xf32>
    %301 = vector.shape_cast %300 : vector<1x8x32xf32> to vector<8x32xf32>
    %302 = vector.shape_cast %299 : vector<8x32xf32> to vector<1x8x32xf32>
    tpu.vector_store %arg23[%c0_107, %c0_108, %c0_109], %302 {strides = array<i32>} : memref<1x8x32xf32, #tpu.memory_space<vmem>>, vector<1x8x32xf32>,
    return
  }
  func.func @transform_0(%arg0: i32) -> (i32, i32, i32) {
    %c0_i32 = arith.constant 0 : i32
    %c0_i32_0 = arith.constant 0 : i32
    %c0_i32_1 = arith.constant 0 : i32
    return %arg0, %c0_i32, %c0_i32_0 : i32, i32, i32
  }
  func.func @transform_1(%arg0: i32) -> (i32, i32, i32) {
    %c0_i32 = arith.constant 0 : i32
    %c0_i32_0 = arith.constant 0 : i32
    %c0_i32_1 = arith.constant 0 : i32
    return %arg0, %c0_i32, %c0_i32_0 : i32, i32, i32
  }
  func.func @transform_2(%arg0: i32) -> (i32, i32) {
    %c0_i32 = arith.constant 0 : i32
    %c0_i32_0 = arith.constant 0 : i32
    %c0_i32_1 = arith.constant 0 : i32
    return %c0_i32, %c0_i32_0 : i32, i32
  }
  func.func @transform_3(%arg0: i32) -> (i32, i32) {
    %c0_i32 = arith.constant 0 : i32
    %c0_i32_0 = arith.constant 0 : i32
    %c0_i32_1 = arith.constant 0 : i32
    return %c0_i32, %c0_i32_0 : i32, i32
  }
  func.func @transform_4(%arg0: i32) -> (i32, i32) {
    %c0_i32 = arith.constant 0 : i32
    %c0_i32_0 = arith.constant 0 : i32
    %c0_i32_1 = arith.constant 0 : i32
    return %c0_i32, %c0_i32_0 : i32, i32
  }
  func.func @transform_5(%arg0: i32) -> (i32, i32) {
    %c0_i32 = arith.constant 0 : i32
    %c0_i32_0 = arith.constant 0 : i32
    %c0_i32_1 = arith.constant 0 : i32
    return %c0_i32, %c0_i32_0 : i32, i32
  }
  func.func @transform_6(%arg0: i32) -> (i32, i32) {
    %c0_i32 = arith.constant 0 : i32
    %c0_i32_0 = arith.constant 0 : i32
    %c0_i32_1 = arith.constant 0 : i32
    return %c0_i32, %c0_i32_0 : i32, i32
  }
  func.func @transform_7(%arg0: i32) -> (i32, i32) {
    %c0_i32 = arith.constant 0 : i32
    %c0_i32_0 = arith.constant 0 : i32
    %c0_i32_1 = arith.constant 0 : i32
    return %c0_i32, %c0_i32_0 : i32, i32
  }
  func.func @transform_8(%arg0: i32) -> (i32, i32) {
    %c0_i32 = arith.constant 0 : i32
    %c0_i32_0 = arith.constant 0 : i32
    %c0_i32_1 = arith.constant 0 : i32
    return %c0_i32, %c0_i32_0 : i32, i32
  }
  func.func @transform_9(%arg0: i32) -> (i32, i32) {
    %c0_i32 = arith.constant 0 : i32
    %c0_i32_0 = arith.constant 0 : i32
    %c0_i32_1 = arith.constant 0 : i32
    return %c0_i32, %c0_i32_0 : i32, i32
  }
  func.func @transform_10(%arg0: i32) -> (i32, i32) {
    %c0_i32 = arith.constant 0 : i32
    %c0_i32_0 = arith.constant 0 : i32
    %c0_i32_1 = arith.constant 0 : i32
    return %c0_i32, %c0_i32_0 : i32, i32
  }
  func.func @transform_11(%arg0: i32) -> (i32, i32) {
    %c0_i32 = arith.constant 0 : i32
    %c0_i32_0 = arith.constant 0 : i32
    %c0_i32_1 = arith.constant 0 : i32
    return %c0_i32, %c0_i32_0 : i32, i32
  }
  func.func @transform_12(%arg0: i32) -> (i32, i32) {
    %c0_i32 = arith.constant 0 : i32
    %c0_i32_0 = arith.constant 0 : i32
    %c0_i32_1 = arith.constant 0 : i32
    return %c0_i32, %c0_i32_0 : i32, i32
  }
  func.func @transform_13(%arg0: i32) -> (i32, i32) {
    %c0_i32 = arith.constant 0 : i32
    %c0_i32_0 = arith.constant 0 : i32
    %c0_i32_1 = arith.constant 0 : i32
    return %c0_i32, %c0_i32_0 : i32, i32
  }
  func.func @transform_14(%arg0: i32) -> (i32, i32) {
    %c0_i32 = arith.constant 0 : i32
    %c0_i32_0 = arith.constant 0 : i32
    %c0_i32_1 = arith.constant 0 : i32
    return %c0_i32, %c0_i32_0 : i32, i32
  }
  func.func @transform_15(%arg0: i32) -> (i32, i32) {
    %c0_i32 = arith.constant 0 : i32
    %c0_i32_0 = arith.constant 0 : i32
    %c0_i32_1 = arith.constant 0 : i32
    return %c0_i32, %c0_i32_0 : i32, i32
  }
  func.func @transform_16(%arg0: i32) -> (i32, i32) {
    %c0_i32 = arith.constant 0 : i32
    %c0_i32_0 = arith.constant 0 : i32
    %c0_i32_1 = arith.constant 0 : i32
    return %c0_i32, %c0_i32_0 : i32, i32
  }
  func.func @transform_17(%arg0: i32) -> (i32, i32) {
    %c0_i32 = arith.constant 0 : i32
    %c0_i32_0 = arith.constant 0 : i32
    %c0_i32_1 = arith.constant 0 : i32
    return %c0_i32, %c0_i32_0 : i32, i32
  }
  func.func @transform_18(%arg0: i32) -> (i32, i32) {
    %c0_i32 = arith.constant 0 : i32
    %c0_i32_0 = arith.constant 0 : i32
    %c0_i32_1 = arith.constant 0 : i32
    return %c0_i32, %c0_i32_0 : i32, i32
  }
  func.func @transform_19(%arg0: i32) -> (i32, i32) {
    %c0_i32 = arith.constant 0 : i32
    %c0_i32_0 = arith.constant 0 : i32
    %c0_i32_1 = arith.constant 0 : i32
    return %c0_i32, %c0_i32_0 : i32, i32
  }
  func.func @transform_20(%arg0: i32) -> (i32, i32) {
    %c0_i32 = arith.constant 0 : i32
    %c0_i32_0 = arith.constant 0 : i32
    %c0_i32_1 = arith.constant 0 : i32
    return %c0_i32, %c0_i32_0 : i32, i32
  }
  func.func @transform_21(%arg0: i32) -> (i32, i32) {
    %c0_i32 = arith.constant 0 : i32
    %c0_i32_0 = arith.constant 0 : i32
    %c0_i32_1 = arith.constant 0 : i32
    return %c0_i32, %c0_i32_0 : i32, i32
  }
  func.func @transform_22(%arg0: i32) -> (i32, i32, i32) {
    %c0_i32 = arith.constant 0 : i32
    %c0_i32_0 = arith.constant 0 : i32
    %c0_i32_1 = arith.constant 0 : i32
    return %arg0, %c0_i32, %c0_i32_0 : i32, i32, i32
  }
}

</mosaic_0001>

<bundles_post_ra>
// kernel: decoder_layer_forward.1
= control target key start
LH: loop header
LB: loop body
LE: loop exit
PB: predicated region body
PF: predicated region fallthrough
CT: control target
= control target key end

     0   :  { %s5116_s0 = inlined_call_operand.hbm [shape: f32[2,8,32], index: 0, kind: input, shape index: {}]   ;;  %s5117_s1 = inlined_call_operand.vmem [shape: f32[2,16,64], index: 1, kind: input, shape index: {}]   ;;  %s5118_s2 = inlined_call_operand.vmem [shape: bf16[32,96], index: 2, kind: input, shape index: {}]   ;;  %s5119_s3 = inlined_call_operand.hbm [shape: f32[1,96], index: 3, kind: input, shape index: {}]   ;;  %s5120_s4 = inlined_call_operand.vmem [shape: bf16[32,32], index: 4, kind: input, shape index: {}]   ;;  %s5121_s5 = inlined_call_operand.hbm [shape: f32[1,32], index: 5, kind: input, shape index: {}]   ;;  %s5122_s6 = inlined_call_operand.hbm [shape: f32[1,32], index: 6, kind: input, shape index: {}]   ;;  %s5123_s7 = inlined_call_operand.hbm [shape: f32[1,32], index: 7, kind: input, shape index: {}]   ;;  %s5124_s8 = inlined_call_operand.hbm [shape: bf16[32,32], index: 8, kind: input, shape index: {}]   ;;  %s5125_s9 = inlined_call_operand.hbm [shape: f32[1,32], index: 9, kind: input, shape index: {}]   ;;  %s5126_s10 = inlined_call_operand.vmem [shape: bf16[64,64], index: 10, kind: input, shape index: {}]   ;;  %s5127_s11 = inlined_call_operand.hbm [shape: f32[1,64], index: 11, kind: input, shape index: {}]   ;;  %s5128_s12 = inlined_call_operand.hbm [shape: bf16[32,32], index: 12, kind: input, shape index: {}]   ;;  %s5129_s13 = inlined_call_operand.hbm [shape: f32[1,32], index: 13, kind: input, shape index: {}]   ;;  %s5130_s14 = inlined_call_operand.hbm [shape: f32[1,32], index: 14, kind: input, shape index: {}]   ;;  %s5131_s15 = inlined_call_operand.hbm [shape: f32[1,32], index: 15, kind: input, shape index: {}]   ;;  %s5132_s16 = inlined_call_operand.hbm [shape: bf16[32,64], index: 16, kind: input, shape index: {}]   ;;  %s5133_s17 = inlined_call_operand.hbm [shape: f32[1,64], index: 17, kind: input, shape index: {}]   ;;  %s5134_s18 = inlined_call_operand.vmem [shape: bf16[64,32], index: 18, kind: input, shape index: {}]   ;;  %s5135_s19 = inlined_call_operand.hbm [shape: f32[1,32], index: 19, kind: input, shape index: {}]   ;;  %s5136_s20 = inlined_call_operand.hbm [shape: f32[1,32], index: 20, kind: input, shape index: {}]   ;;  %s5137_s21 = inlined_call_operand.hbm [shape: f32[1,32], index: 21, kind: input, shape index: {}]   ;;  %s5138_s22 = inlined_call_operand.hbm [shape: f32[2,8,32], index: 22, kind: output, shape index: {}]  }
   0x1   :  { %5173 = sst [smem:[#allocation46_spill]] %s5116_s0 }
   0x2   :  { %5174 = sst [smem:[#allocation47_spill]] %s5117_s1 }
   0x3   :  { %5175 = sst [smem:[#allocation48_spill]] %s5118_s2 }
   0x4   :  { %5176 = sst [smem:[#allocation49_spill]] %s5119_s3 }
   0x5   :  { %5177 = sst [smem:[#allocation50_spill]] %s5120_s4 }
   0x6   :  { %5178 = sst [smem:[#allocation51_spill]] %s5121_s5 }
   0x7   :  { %5179 = sst [smem:[#allocation52_spill]] %s5122_s6 }
   0x8   :  { %5180 = sst [smem:[#allocation53_spill]] %s5123_s7 }
   0x9   :  { %5181 = sst [smem:[#allocation54_spill]] %s5124_s8 }
   0xa   :  { %5182 = sst [smem:[#allocation55_spill]] %s5125_s9 }
   0xb   :  { %5183 = sst [smem:[#allocation56_spill]] %s5126_s10 }
   0xc   :  { %5184 = sst [smem:[#allocation57_spill]] %s5127_s11 }
   0xd   :  { %5185 = sst [smem:[#allocation58_spill]] %s5128_s12 }
   0xe   :  { %5186 = sst [smem:[#allocation59_spill]] %s5134_s18 }
   0xf   :  { %5187 = sst [smem:[#allocation60_spill]] %s5138_s22 }
  0x10   :  { %27 = vsyncpa [#allocation3], 0 }
  0x11   :  { %29 = vsyncpa [#allocation3 + $0x1], 0 }
  0x12   :  { %30 = vsyncpa [#allocation6], 0 }
  0x13   :  { %31 = vsyncpa [#allocation9], 0 }
  0x14   :  { %32 = vsyncpa [#allocation12], 0 }
  0x15   :  { %33 = vsyncpa [#allocation15], 0 }
  0x16   :  { %34 = vsyncpa [#allocation18], 0 }
  0x17   :  { %35 = vsyncpa [#allocation21], 0 }
  0x18   :  { %36 = vsyncpa [#allocation24], 0 }
  0x19   :  { %37 = vsyncpa [#allocation27], 0 }
  0x1a   :  { %38 = vsyncpa [#allocation4], 0 }
  0x1b   :  { %40 = vsyncpa [#allocation4 + $0x1], 0  ;;  %s4302_s3 = smov 0   ;;  %s4304_s28 = smov 0  }
  0x1c   :  { %s4306_s29 = smov 0   ;;  %s4308_s30 = smov 0  }
  0x1d LB: > { %5188 = sst [smem:[#allocation40_spill]] %s4140_s3  ;;  %s4154_s4 = smov [#allocation5]   ;;  %s4152_s30 = sphi %s4308_s30, %s4669_s30   ;;  %s4148_s29 = sphi %s4306_s29, %s5260_s29   ;;  %s4144_s28 = sphi %s4304_s28, %s5259_s28   ;;  %s4140_s3 = sphi %s4302_s3, %s5258_s3  }
  0x1e   : > { %5189 = sst [smem:[#allocation41_spill]] %s4144_s28  ;;  %s565_s0 = sshll.u32 %s4154_s4, 4  ;;  %s4328_s0 = int_to_ptr.vmem [resolvable:$true] %s565_s0 }
  0x1f   : > { %5190 = sst [smem:[#allocation42_spill]] %s4148_s29  ;;  %s4323_s23 = sadd.s32 4294967295, %s4152_s30  }
  0x20   : > { %5191 = sst [smem:[#allocation43_spill]] %s4152_s30  ;;  %p2928_p0 = scmp.ge.s32.totalorder %s4152_s30, 1 }
  0x21   : > { %5192 = sst [smem:[#allocation44_spill]] %s4323_s23  ;;  %p5158_p1 = scmp.eq.s32.totalorder %s4323_s23, 0 }
  0x22   : > { %p549_p2 = scmp.lt.s32.totalorder %s4152_s30, 3  ;;  %s4155_s5 = smov [#allocation8]  }
  0x23   : > { %s590_s24 = sshll.u32 %s4155_s5, 4  ;;  %s4156_s6 = smov [#allocation11]   ;;  %s4337_s24 = int_to_ptr.vmem [resolvable:$true] %s590_s24 }
  0x24   : > { %p4330_p3 = pnand %p2928_p0, %p549_p2  ;;  %s611_s25 = sshll.u32 %s4156_s6, 4  ;;  %s4345_s25 = int_to_ptr.vmem [resolvable:$true] %s611_s25 }
  0x25   : > { %s5196_s4 = sld [smem:[#allocation49_spill]] }
  0x26   : > { %s5193_s1 = scalar_select %p4330_p3, 1, 0 }
  0x27   : > { %p3370_p5 = pneg %p4330_p3 }
  0x28   : > { %5194 = sst [smem:[#allocation45_spill]] %s5193_s1 }
  0x29   : > { %p4341_p6 = pnand %p3370_p5, %p5158_p1 }
  0x2b   : > { %s3576_s22 = scalar_lea.hbm %s5196_s4, 16  ;;  %p4355_p8 = pneg %p4341_p6 }
  0x2c   : > { %p3577_p7 = scmp.ne.s32.totalorder %s5196_s4, %s3576_s22  ;;  %p3583_p11 = scmp.lt.u32.totalorder %s3576_s22, %s5196_s4 }
  0x2e   : > { %p3579_p9 = pnand %p4355_p8, %p3577_p7 }
  0x30   : > { %p3580_p10 = pneg %p3579_p9 }
  0x32   : > { %p3585_p12 = pnand %p3583_p11, %p3580_p10 }
  0x34   : > { %3588 = shalt.err (!%p3585_p12)
}
  0x35   : > { %s3589_s10 = scalar_lea.vmem %s4328_s0, 16  ;;  %s3596_s18 = scalar_lea.vmem %s4328_s0, 32 }
  0x36   : > { %p3590_p13 = scmp.ne.s32.totalorder %s4328_s0, %s3589_s10  ;;  %p3597_p5 = scmp.lt.s32.totalorder %s4328_s0, %s4328_s0 }
  0x37   : > { %p3598_p7 = scmp.lt.s32.totalorder %s3596_s18, %s3589_s10 }
  0x38   : > { %p3592_p0 = pnand %p3590_p13, %p4355_p8 }
  0x39   : > { %p3599_p9 = por %p3598_p7, %p3597_p5 }
  0x3a   : > { %p3593_p2 = pneg %p3592_p0 }
  0x3c   : > { %p3600_p4 = pnand %p3599_p9, %p3593_p2 }
  0x3e   : > { %3603 = shalt.err (!%p3600_p4)
}
  0x3f   : > { %3373 = dma.hbm_to_vmem [thread:$0]  (!%p4341_p6), %s5196_s4, 16, %s4328_s0, [#allocation6]  }
  0x40   : > { %s5198_s6 = sld [smem:[#allocation52_spill]] }
  0x46   : > { %s3604_s23 = scalar_lea.hbm %s5198_s6, 16 }
  0x47   : > { %p3605_p10 = scmp.ne.s32.totalorder %s5198_s6, %s3604_s23  ;;  %p3611_p4 = scmp.lt.u32.totalorder %s3604_s23, %s5198_s6 }
  0x49   : > { %p3607_p11 = pnand %p3605_p10, %p4355_p8 }
  0x4b   : > { %p3608_p12 = pneg %p3607_p11 }
  0x4d   : > { %p3613_p13 = pnand %p3611_p4, %p3608_p12 }
  0x4f   : > { %3616 = shalt.err (!%p3613_p13)
}
  0x50   : > { %s3617_s0 = scalar_lea.vmem %s4337_s24, 16  ;;  %s3624_s3 = scalar_lea.vmem %s4337_s24, 32 }
  0x51   : > { %p3618_p0 = scmp.ne.s32.totalorder %s4337_s24, %s3617_s0  ;;  %p3625_p7 = scmp.lt.s32.totalorder %s4337_s24, %s4337_s24 }
  0x52   : > { %p3626_p9 = scmp.lt.s32.totalorder %s3624_s3, %s3617_s0 }
  0x53   : > { %p3620_p2 = pnand %p3618_p0, %p4355_p8 }
  0x54   : > { %p3627_p10 = por %p3626_p9, %p3625_p7 }
  0x55   : > { %p3621_p5 = pneg %p3620_p2 }
  0x57   : > { %p3628_p11 = pnand %p3627_p10, %p3621_p5 }
  0x59   : > { %3631 = shalt.err (!%p3628_p11)
}
  0x5a   : > { %3379 = dma.hbm_to_vmem [thread:$0]  (!%p4341_p6), %s5198_s6, 16, %s4337_s24, [#allocation9]  }
  0x5b   : > { %s5199_s8 = sld [smem:[#allocation54_spill]] }
  0x61   : > { %s3632_s2 = scalar_lea.hbm %s5199_s8, 256 }
  0x62   : > { %p3633_p12 = scmp.ne.s32.totalorder %s5199_s8, %s3632_s2  ;;  %p3639_p0 = scmp.lt.u32.totalorder %s3632_s2, %s5199_s8 }
  0x64   : > { %p3635_p4 = pnand %p3633_p12, %p4355_p8 }
  0x66   : > { %p3636_p13 = pneg %p3635_p4 }
  0x68   : > { %p3641_p2 = pnand %p3639_p0, %p3636_p13 }
  0x6a   : > { %3644 = shalt.err (!%p3641_p2)
}
  0x6b   : > { %s3645_s24 = scalar_lea.vmem %s4345_s25, 256  ;;  %p3653_p10 = scmp.lt.s32.totalorder %s4345_s25, %s4345_s25 }
  0x6c   : > { %p3646_p5 = scmp.ne.s32.totalorder %s4345_s25, %s3645_s24  ;;  %p3654_p11 = scmp.lt.s32.totalorder %s3645_s24, %s3645_s24 }
  0x6e   : > { %p3648_p7 = pnand %p3646_p5, %p4355_p8  ;;  %p3655_p12 = por %p3654_p11, %p3653_p10 }
  0x70   : > { %p3649_p9 = pneg %p3648_p7 }
  0x72   : > { %p3656_p4 = pnand %p3655_p12, %p3649_p9 }
  0x74   : > { %3659 = shalt.err (!%p3656_p4)
}
  0x75   : > { %s4157_s3 = smov 64   ;;  %s4158_s28 = smov 4  }
  0x76   : > { %3385 = dma.hbm_to_vmem [thread:$0]  (!%p4341_p6), %s5199_s8, 256, %s4345_s25, [#allocation12], %s4157_s3, %s4157_s3, %s4158_s28  }
  0x77   : > { %s4159_s1 = smov [#allocation14]   ;;  %s4160_s27 = smov [#allocation17]  }
  0x78   : > { %s639_s2 = sshll.u32 %s4159_s1, 4  ;;  %s663_s10 = sshll.u32 %s4160_s27, 4  ;;  %s640_s2 = int_to_ptr.vmem [resolvable:$true] %s639_s2  ;;  %s664_s10 = int_to_ptr.vmem [resolvable:$true] %s663_s10 }
  0x79   : > { %s5200_s11 = sld [smem:[#allocation57_spill]] }
  0x7f   : > { %s3660_s24 = scalar_lea.hbm %s5200_s11, 16 }
  0x80   : > { %p3661_p13 = scmp.ne.s32.totalorder %s5200_s11, %s3660_s24  ;;  %p3667_p5 = scmp.lt.u32.totalorder %s3660_s24, %s5200_s11 }
  0x82   : > { %p3663_p0 = pnand %p3661_p13, %p4355_p8 }
  0x84   : > { %p3664_p2 = pneg %p3663_p0 }
  0x86   : > { %p3669_p7 = pnand %p3667_p5, %p3664_p2 }
  0x88   : > { %3672 = shalt.err (!%p3669_p7)
}
  0x89   : > { %s3673_s25 = scalar_lea.vmem %s640_s2, 16  ;;  %s3680_s23 = scalar_lea.vmem %s640_s2, 32 }
  0x8a   : > { %p3674_p9 = scmp.ne.s32.totalorder %s640_s2, %s3673_s25  ;;  %p3681_p12 = scmp.lt.s32.totalorder %s640_s2, %s640_s2 }
  0x8b   : > { %p3682_p4 = scmp.lt.s32.totalorder %s3680_s23, %s3673_s25 }
  0x8c   : > { %p3676_p10 = pnand %p3674_p9, %p4355_p8 }
  0x8d   : > { %p3683_p1 = por %p3682_p4, %p3681_p12 }
  0x8e   : > { %p3677_p11 = pneg %p3676_p10 }
  0x90   : > { %p3684_p3 = pnand %p3683_p1, %p3677_p11 }
  0x92   : > { %3687 = shalt.err (!%p3684_p3)
}
  0x93   : > { %3391 = dma.hbm_to_vmem [thread:$0]  (!%p4341_p6), %s5200_s11, 16, %s640_s2, [#allocation15]  }
  0x94   : > { %s3688_s22 = scalar_lea.hbm %s5129_s13, 16 }
  0x95   : > { %p3689_p13 = scmp.ne.s32.totalorder %s5129_s13, %s3688_s22  ;;  %p3695_p3 = scmp.lt.u32.totalorder %s3688_s22, %s5129_s13 }
  0x97   : > { %p3691_p0 = pnand %p3689_p13, %p4355_p8 }
  0x99   : > { %p3692_p1 = pneg %p3691_p0 }
  0x9b   : > { %p3697_p2 = pnand %p3695_p3, %p3692_p1 }
  0x9d   : > { %3700 = shalt.err (!%p3697_p2)
}
  0x9e   : > { %s3701_s24 = scalar_lea.vmem %s664_s10, 16  ;;  %s3708_s2 = scalar_lea.vmem %s664_s10, 32 }
  0x9f   : > { %p3702_p5 = scmp.ne.s32.totalorder %s664_s10, %s3701_s24  ;;  %p3709_p10 = scmp.lt.s32.totalorder %s664_s10, %s664_s10 }
  0xa0   : > { %p3710_p11 = scmp.lt.s32.totalorder %s3708_s2, %s3701_s24 }
  0xa1   : > { %p3704_p7 = pnand %p3702_p5, %p4355_p8 }
  0xa2   : > { %p3711_p12 = por %p3710_p11, %p3709_p10 }
  0xa3   : > { %p3705_p9 = pneg %p3704_p7 }
  0xa5   : > { %p3712_p4 = pnand %p3711_p12, %p3705_p9 }
  0xa7   : > { %3715 = shalt.err (!%p3712_p4)
}
  0xa8   : > { %3397 = dma.hbm_to_vmem [thread:$0]  (!%p4341_p6), %s5129_s13, 16, %s664_s10, [#allocation18]  }
  0xa9   : > { %s4161_s4 = smov [#allocation20]   ;;  %s4162_s29 = smov [#allocation23]  }
  0xaa   : > { %s685_s6 = sshll.u32 %s4161_s4, 4  ;;  %s709_s30 = sshll.u32 %s4162_s29, 4  ;;  %s686_s6 = int_to_ptr.vmem [resolvable:$true] %s685_s6  ;;  %s710_s30 = int_to_ptr.vmem [resolvable:$true] %s709_s30 }
  0xab   : > { %s3716_s27 = scalar_lea.hbm %s5131_s15, 16 }
  0xac   : > { %p3717_p13 = scmp.ne.s32.totalorder %s5131_s15, %s3716_s27  ;;  %p3723_p3 = scmp.lt.u32.totalorder %s3716_s27, %s5131_s15 }
  0xae   : > { %p3719_p0 = pnand %p3717_p13, %p4355_p8 }
  0xb0   : > { %p3720_p1 = pneg %p3719_p0 }
  0xb2   : > { %p3725_p2 = pnand %p3723_p3, %p3720_p1 }
  0xb4   : > { %3728 = shalt.err (!%p3725_p2)
}
  0xb5   : > { %s3729_s10 = scalar_lea.vmem %s686_s6, 16  ;;  %s3736_s25 = scalar_lea.vmem %s686_s6, 32 }
  0xb6   : > { %p3730_p5 = scmp.ne.s32.totalorder %s686_s6, %s3729_s10  ;;  %p3737_p10 = scmp.lt.s32.totalorder %s686_s6, %s686_s6 }
  0xb7   : > { %p3738_p11 = scmp.lt.s32.totalorder %s3736_s25, %s3729_s10 }
  0xb8   : > { %p3732_p7 = pnand %p3730_p5, %p4355_p8 }
  0xb9   : > { %p3739_p12 = por %p3738_p11, %p3737_p10 }
  0xba   : > { %p3733_p9 = pneg %p3732_p7 }
  0xbc   : > { %p3740_p4 = pnand %p3739_p12, %p3733_p9 }
  0xbe   : > { %3743 = shalt.err (!%p3740_p4)
}
  0xbf   : > { %3403 = dma.hbm_to_vmem [thread:$0]  (!%p4341_p6), %s5131_s15, 16, %s686_s6, [#allocation21]  }
  0xc0   : > { %s3744_s1 = scalar_lea.hbm %s5133_s17, 16 }
  0xc1   : > { %p3745_p13 = scmp.ne.s32.totalorder %s5133_s17, %s3744_s1  ;;  %p3751_p3 = scmp.lt.u32.totalorder %s3744_s1, %s5133_s17 }
  0xc3   : > { %p3747_p0 = pnand %p3745_p13, %p4355_p8 }
  0xc5   : > { %p3748_p1 = pneg %p3747_p0 }
  0xc7   : > { %p3753_p2 = pnand %p3751_p3, %p3748_p1 }
  0xc9   : > { %3756 = shalt.err (!%p3753_p2)
}
  0xca   : > { %s3757_s2 = scalar_lea.vmem %s710_s30, 16  ;;  %s3764_s6 = scalar_lea.vmem %s710_s30, 32 }
  0xcb   : > { %p3758_p5 = scmp.ne.s32.totalorder %s710_s30, %s3757_s2  ;;  %p3765_p10 = scmp.lt.s32.totalorder %s710_s30, %s710_s30 }
  0xcc   : > { %p3766_p11 = scmp.lt.s32.totalorder %s3764_s6, %s3757_s2 }
  0xcd   : > { %p3760_p7 = pnand %p3758_p5, %p4355_p8 }
  0xce   : > { %p3767_p12 = por %p3766_p11, %p3765_p10 }
  0xcf   : > { %p3761_p9 = pneg %p3760_p7 }
  0xd1   : > { %p3768_p4 = pnand %p3767_p12, %p3761_p9 }
  0xd3   : > { %3771 = shalt.err (!%p3768_p4)
}
  0xd4   : > { %3409 = dma.hbm_to_vmem [thread:$0]  (!%p4341_p6), %s5133_s17, 16, %s710_s30, [#allocation24]  }
  0xd5   : > { %s4163_s23 = smov [#allocation26]   ;;  %s4164_s29 = smov [#allocation7]  }
  0xd6   : > { %s734_s4 = sshll.u32 %s4163_s23, 4  ;;  %s579_s22 = sshll.u32 %s4164_s29, 4  ;;  %s735_s4 = int_to_ptr.vmem [resolvable:$true] %s734_s4  ;;  %s580_s22 = int_to_ptr.vmem [resolvable:$true] %s579_s22 }
  0xd7   : > { %s3772_s18 = scalar_lea.hbm %s5136_s20, 16 }
  0xd8   : > { %p3773_p13 = scmp.ne.s32.totalorder %s5136_s20, %s3772_s18  ;;  %p3779_p3 = scmp.lt.u32.totalorder %s3772_s18, %s5136_s20 }
  0xda   : > { %p3775_p0 = pnand %p3773_p13, %p4355_p8 }
  0xdc   : > { %p3776_p1 = pneg %p3775_p0 }
  0xde   : > { %p3781_p2 = pnand %p3779_p3, %p3776_p1 }
  0xe0   : > { %3784 = shalt.err (!%p3781_p2)
}
  0xe1   : > { %s3785_s30 = scalar_lea.vmem %s735_s4, 16  ;;  %s3792_s10 = scalar_lea.vmem %s735_s4, 32 }
  0xe2   : > { %p3786_p5 = scmp.ne.s32.totalorder %s735_s4, %s3785_s30  ;;  %p3793_p10 = scmp.lt.s32.totalorder %s735_s4, %s735_s4 }
  0xe3   : > { %p3794_p11 = scmp.lt.s32.totalorder %s3792_s10, %s3785_s30 }
  0xe4   : > { %p3788_p7 = pnand %p3786_p5, %p4355_p8 }
  0xe5   : > { %p3795_p12 = por %p3794_p11, %p3793_p10 }
  0xe6   : > { %p3789_p9 = pneg %p3788_p7 }
  0xe8   : > { %p3796_p4 = pnand %p3795_p12, %p3789_p9 }
  0xea   : > { %3799 = shalt.err (!%p3796_p4)
}
  0xeb   : > { %3415 = dma.hbm_to_vmem [thread:$0]  (!%p4341_p6), %s5136_s20, 16, %s735_s4, [#allocation27]  }
  0xec   : > { %s5201_s27 = sld [smem:[#allocation51_spill]] }
  0xf2   : > { %s3800_s18 = scalar_lea.hbm %s5201_s27, 16 }
  0xf3   : > { %p3801_p13 = scmp.ne.s32.totalorder %s5201_s27, %s3800_s18  ;;  %p3807_p3 = scmp.lt.u32.totalorder %s3800_s18, %s5201_s27 }
  0xf5   : > { %p3803_p0 = pnand %p3801_p13, %p4355_p8 }
  0xf7   : > { %p3804_p1 = pneg %p3803_p0 }
  0xf9   : > { %p3809_p2 = pnand %p3807_p3, %p3804_p1 }
  0xfb   : > { %3812 = shalt.err (!%p3809_p2)
}
  0xfc   : > { %s3813_s30 = scalar_lea.vmem %s580_s22, 16  ;;  %s3820_s4 = scalar_lea.vmem %s580_s22, 32 }
  0xfd   : > { %p3814_p5 = scmp.ne.s32.totalorder %s580_s22, %s3813_s30  ;;  %p3821_p10 = scmp.lt.s32.totalorder %s580_s22, %s580_s22 }
  0xfe   : > { %p3822_p11 = scmp.lt.s32.totalorder %s3820_s4, %s3813_s30 }
  0xff   : > { %p3816_p7 = pnand %p3814_p5, %p4355_p8 }
 0x100   : > { %p3823_p12 = por %p3822_p11, %p3821_p10 }
 0x101   : > { %p3817_p9 = pneg %p3816_p7 }
 0x103   : > { %p3824_p4 = pnand %p3823_p12, %p3817_p9 }
 0x105   : > { %3827 = shalt.err (!%p3824_p4)
}
 0x106   : > { %3376 = dma.hbm_to_vmem [thread:$0]  (!%p4341_p6), %s5201_s27, 16, %s580_s22, [#allocation6]  }
 0x107   : > { %s4165_s23 = smov [#allocation10]   ;;  %s4166_s1 = smov [#allocation13]  }
 0x108   : > { %s601_s29 = sshll.u32 %s4165_s23, 4  ;;  %s625_s18 = sshll.u32 %s4166_s1, 4  ;;  %s602_s29 = int_to_ptr.vmem [resolvable:$true] %s601_s29  ;;  %s626_s18 = int_to_ptr.vmem [resolvable:$true] %s625_s18 }
 0x109   : > { %s5202_s7 = sld [smem:[#allocation53_spill]] }
 0x10f   : > { %s3828_s2 = scalar_lea.hbm %s5202_s7, 16 }
 0x110   : > { %p3829_p13 = scmp.ne.s32.totalorder %s5202_s7, %s3828_s2  ;;  %p3835_p3 = scmp.lt.u32.totalorder %s3828_s2, %s5202_s7 }
 0x112   : > { %p3831_p0 = pnand %p3829_p13, %p4355_p8 }
 0x114   : > { %p3832_p1 = pneg %p3831_p0 }
 0x116   : > { %p3837_p2 = pnand %p3835_p3, %p3832_p1 }
 0x118   : > { %3840 = shalt.err (!%p3837_p2)
}
 0x119   : > { %s3841_s22 = scalar_lea.vmem %s602_s29, 16  ;;  %s3848_s25 = scalar_lea.vmem %s602_s29, 32 }
 0x11a   : > { %p3842_p5 = scmp.ne.s32.totalorder %s602_s29, %s3841_s22  ;;  %p3849_p10 = scmp.lt.s32.totalorder %s602_s29, %s602_s29 }
 0x11b   : > { %p3850_p11 = scmp.lt.s32.totalorder %s3848_s25, %s3841_s22 }
 0x11c   : > { %p3844_p7 = pnand %p3842_p5, %p4355_p8 }
 0x11d   : > { %p3851_p12 = por %p3850_p11, %p3849_p10 }
 0x11e   : > { %p3845_p9 = pneg %p3844_p7 }
 0x120   : > { %p3852_p4 = pnand %p3851_p12, %p3845_p9 }
 0x122   : > { %3855 = shalt.err (!%p3852_p4)
}
 0x123   : > { %3382 = dma.hbm_to_vmem [thread:$0]  (!%p4341_p6), %s5202_s7, 16, %s602_s29, [#allocation9]  }
 0x124   : > { %s5203_s9 = sld [smem:[#allocation55_spill]] }
 0x12a   : > { %s3856_s2 = scalar_lea.hbm %s5203_s9, 16 }
 0x12b   : > { %p3857_p13 = scmp.ne.s32.totalorder %s5203_s9, %s3856_s2  ;;  %p3863_p3 = scmp.lt.u32.totalorder %s3856_s2, %s5203_s9 }
 0x12d   : > { %p3859_p0 = pnand %p3857_p13, %p4355_p8 }
 0x12f   : > { %p3860_p1 = pneg %p3859_p0 }
 0x131   : > { %p3865_p2 = pnand %p3863_p3, %p3860_p1 }
 0x133   : > { %3868 = shalt.err (!%p3865_p2)
}
 0x134   : > { %s3869_s22 = scalar_lea.vmem %s626_s18, 16  ;;  %s3876_s29 = scalar_lea.vmem %s626_s18, 32 }
 0x135   : > { %p3870_p5 = scmp.ne.s32.totalorder %s626_s18, %s3869_s22  ;;  %p3877_p10 = scmp.lt.s32.totalorder %s626_s18, %s626_s18 }
 0x136   : > { %p3878_p11 = scmp.lt.s32.totalorder %s3876_s29, %s3869_s22 }
 0x137   : > { %p3872_p7 = pnand %p3870_p5, %p4355_p8 }
 0x138   : > { %p3879_p12 = por %p3878_p11, %p3877_p10 }
 0x139   : > { %p3873_p9 = pneg %p3872_p7 }
 0x13b   : > { %p3880_p4 = pnand %p3879_p12, %p3873_p9 }
 0x13d   : > { %3883 = shalt.err (!%p3880_p4)
}
 0x13e   : > { %3388 = dma.hbm_to_vmem [thread:$0]  (!%p4341_p6), %s5203_s9, 16, %s626_s18, [#allocation12]  }
 0x13f   : > { %s4167_s1 = smov [#allocation16]   ;;  %s4168_s24 = smov [#allocation19]  }
 0x140   : > { %s649_s0 = sshll.u32 %s4167_s1, 4  ;;  %s674_s2 = sshll.u32 %s4168_s24, 4  ;;  %s650_s0 = int_to_ptr.vmem [resolvable:$true] %s649_s0  ;;  %s675_s2 = int_to_ptr.vmem [resolvable:$true] %s674_s2 }
 0x141   : > { %s5204_s12 = sld [smem:[#allocation58_spill]] }
 0x147   : > { %s3884_s4 = scalar_lea.hbm %s5204_s12, 256 }
 0x148   : > { %p3885_p13 = scmp.ne.s32.totalorder %s5204_s12, %s3884_s4  ;;  %p3891_p3 = scmp.lt.u32.totalorder %s3884_s4, %s5204_s12 }
 0x14a   : > { %p3887_p0 = pnand %p3885_p13, %p4355_p8 }
 0x14c   : > { %p3888_p1 = pneg %p3887_p0 }
 0x14e   : > { %p3893_p2 = pnand %p3891_p3, %p3888_p1 }
 0x150   : > { %3896 = shalt.err (!%p3893_p2)
}
 0x151   : > { %s3897_s18 = scalar_lea.vmem %s650_s0, 256  ;;  %p3905_p10 = scmp.lt.s32.totalorder %s650_s0, %s650_s0 }
 0x152   : > { %p3898_p5 = scmp.ne.s32.totalorder %s650_s0, %s3897_s18  ;;  %p3906_p11 = scmp.lt.s32.totalorder %s3897_s18, %s3897_s18 }
 0x154   : > { %p3900_p7 = pnand %p3898_p5, %p4355_p8  ;;  %p3907_p12 = por %p3906_p11, %p3905_p10 }
 0x156   : > { %p3901_p9 = pneg %p3900_p7 }
 0x158   : > { %p3908_p4 = pnand %p3907_p12, %p3901_p9 }
 0x15a   : > { %3911 = shalt.err (!%p3908_p4)
}
 0x15b   : > { %3394 = dma.hbm_to_vmem [thread:$0]  (!%p4341_p6), %s5204_s12, 256, %s650_s0, [#allocation15], %s4157_s3, %s4157_s3, %s4158_s28  }
 0x15c   : > { %s3912_s30 = scalar_lea.hbm %s5130_s14, 16 }
 0x15d   : > { %p3913_p13 = scmp.ne.s32.totalorder %s5130_s14, %s3912_s30  ;;  %p3919_p3 = scmp.lt.u32.totalorder %s3912_s30, %s5130_s14 }
 0x15f   : > { %p3915_p0 = pnand %p3913_p13, %p4355_p8 }
 0x161   : > { %p3916_p1 = pneg %p3915_p0 }
 0x163   : > { %p3921_p2 = pnand %p3919_p3, %p3916_p1 }
 0x165   : > { %3924 = shalt.err (!%p3921_p2)
}
 0x166   : > { %s3925_s25 = scalar_lea.vmem %s675_s2, 16  ;;  %s3932_s0 = scalar_lea.vmem %s675_s2, 32 }
 0x167   : > { %p3926_p5 = scmp.ne.s32.totalorder %s675_s2, %s3925_s25  ;;  %p3933_p10 = scmp.lt.s32.totalorder %s675_s2, %s675_s2 }
 0x168   : > { %p3934_p11 = scmp.lt.s32.totalorder %s3932_s0, %s3925_s25 }
 0x169   : > { %p3928_p7 = pnand %p3926_p5, %p4355_p8 }
 0x16a   : > { %p3935_p12 = por %p3934_p11, %p3933_p10 }
 0x16b   : > { %p3929_p9 = pneg %p3928_p7 }
 0x16d   : > { %p3936_p4 = pnand %p3935_p12, %p3929_p9 }
 0x16f   : > { %3939 = shalt.err (!%p3936_p4)
}
 0x170   : > { %3400 = dma.hbm_to_vmem [thread:$0]  (!%p4341_p6), %s5130_s14, 16, %s675_s2, [#allocation18]  }
 0x171   : > { %s4169_s1 = smov [#allocation22]   ;;  %s4170_s6 = smov [#allocation25]  }
 0x172   : > { %s695_s24 = sshll.u32 %s4169_s1, 4  ;;  %s723_s30 = sshll.u32 %s4170_s6, 4  ;;  %s696_s24 = int_to_ptr.vmem [resolvable:$true] %s695_s24  ;;  %s724_s30 = int_to_ptr.vmem [resolvable:$true] %s723_s30 }
 0x173   : > { %s3940_s22 = scalar_lea.hbm %s5132_s16, 256 }
 0x174   : > { %p3941_p13 = scmp.ne.s32.totalorder %s5132_s16, %s3940_s22  ;;  %p3947_p3 = scmp.lt.u32.totalorder %s3940_s22, %s5132_s16 }
 0x176   : > { %p3943_p0 = pnand %p3941_p13, %p4355_p8 }
 0x178   : > { %p3944_p1 = pneg %p3943_p0 }
 0x17a   : > { %p3949_p2 = pnand %p3947_p3, %p3944_p1 }
 0x17c   : > { %3952 = shalt.err (!%p3949_p2)
}
 0x17d   : > { %s3953_s2 = scalar_lea.vmem %s696_s24, 256  ;;  %p3961_p10 = scmp.lt.s32.totalorder %s696_s24, %s696_s24 }
 0x17e   : > { %p3954_p5 = scmp.ne.s32.totalorder %s696_s24, %s3953_s2  ;;  %p3962_p11 = scmp.lt.s32.totalorder %s3953_s2, %s3953_s2 }
 0x180   : > { %p3956_p7 = pnand %p3954_p5, %p4355_p8  ;;  %p3963_p12 = por %p3962_p11, %p3961_p10 }
 0x182   : > { %p3957_p9 = pneg %p3956_p7 }
 0x184   : > { %p3964_p4 = pnand %p3963_p12, %p3957_p9 }
 0x186   : > { %3967 = shalt.err (!%p3964_p4)
}
 0x187   : > { %3406 = dma.hbm_to_vmem [thread:$0]  (!%p4341_p6), %s5132_s16, 256, %s696_s24, [#allocation21], %s4157_s3, %s4157_s3, %s4158_s28  }
 0x188   : > { %s3968_s10 = scalar_lea.hbm %s5135_s19, 16 }
 0x189   : > { %p3969_p13 = scmp.ne.s32.totalorder %s5135_s19, %s3968_s10  ;;  %p3975_p3 = scmp.lt.u32.totalorder %s3968_s10, %s5135_s19 }
 0x18b   : > { %p3971_p0 = pnand %p3969_p13, %p4355_p8 }
 0x18d   : > { %p3972_p1 = pneg %p3971_p0 }
 0x18f   : > { %p3977_p2 = pnand %p3975_p3, %p3972_p1 }
 0x191   : > { %3980 = shalt.err (!%p3977_p2)
}
 0x192   : > { %s3981_s18 = scalar_lea.vmem %s724_s30, 16  ;;  %s3988_s3 = scalar_lea.vmem %s724_s30, 32 }
 0x193   : > { %p3982_p5 = scmp.ne.s32.totalorder %s724_s30, %s3981_s18  ;;  %p3989_p10 = scmp.lt.s32.totalorder %s724_s30, %s724_s30 }
 0x194   : > { %p3990_p11 = scmp.lt.s32.totalorder %s3988_s3, %s3981_s18 }
 0x195   : > { %p3984_p7 = pnand %p3982_p5, %p4355_p8 }
 0x196   : > { %p3991_p12 = por %p3990_p11, %p3989_p10 }
 0x197   : > { %p3985_p9 = pneg %p3984_p7 }
 0x199   : > { %p3992_p4 = pnand %p3991_p12, %p3985_p9 }
 0x19b   : > { %3995 = shalt.err (!%p3992_p4)
}
 0x19c   : > { %3412 = dma.hbm_to_vmem [thread:$0]  (!%p4341_p6), %s5135_s19, 16, %s724_s30, [#allocation24]  }
 0x19d   : > { %s4171_s2 = smov [#allocation28]   ;;  %s3996_s4 = scalar_lea.hbm %s5137_s21, 16 }
 0x19e   : > { %s745_s23 = sshll.u32 %s4171_s2, 4  ;;  %p3997_p13 = scmp.ne.s32.totalorder %s5137_s21, %s3996_s4  ;;  %s746_s23 = int_to_ptr.vmem [resolvable:$true] %s745_s23 }
 0x19f   : > { %p4003_p3 = scmp.lt.u32.totalorder %s3996_s4, %s5137_s21 }
 0x1a0   : > { %p3999_p0 = pnand %p3997_p13, %p4355_p8 }
 0x1a2   : > { %p4000_p1 = pneg %p3999_p0 }
 0x1a4   : > { %p4005_p2 = pnand %p4003_p3, %p4000_p1 }
 0x1a6   : > { %4008 = shalt.err (!%p4005_p2)
}
 0x1a7   : > { %s4009_s30 = scalar_lea.vmem %s746_s23, 16  ;;  %s4016_s0 = scalar_lea.vmem %s746_s23, 32 }
 0x1a8   : > { %p4010_p5 = scmp.ne.s32.totalorder %s746_s23, %s4009_s30  ;;  %p4017_p10 = scmp.lt.s32.totalorder %s746_s23, %s746_s23 }
 0x1a9   : > { %p4018_p11 = scmp.lt.s32.totalorder %s4016_s0, %s4009_s30 }
 0x1aa   : > { %p4012_p7 = pnand %p4010_p5, %p4355_p8 }
 0x1ab   : > { %p4019_p12 = por %p4018_p11, %p4017_p10 }
 0x1ac   : > { %p4013_p9 = pneg %p4012_p7 }
 0x1ae   : > { %p4020_p4 = pnand %p4019_p12, %p4013_p9 }
 0x1b0   : > { %4023 = shalt.err (!%p4020_p4)
}
 0x1b1   : > { %s5205_s28 = sld [smem:[#allocation43_spill]]  ;;  %s5206_s24 = sld [smem:[#allocation42_spill]] }
 0x1b2   : > { %s5207_s2 = sld [smem:[#allocation41_spill]]  ;;  %s5208_s5 = sld [smem:[#allocation40_spill]] }
 0x1b3   : > { %s5209_s1 = sld [smem:[#allocation44_spill]] }
 0x1b4   : > { %3418 = dma.hbm_to_vmem [thread:$0]  (!%p4341_p6), %s5137_s21, 16, %s746_s23, [#allocation27]  }
 0x1b7   : > { %s2927_s6 = sadd.s32 4294967294, %s5205_s28   ;;  %s4669_s30 = sadd.s32 1, %s5205_s28  }
 0x1b8   : > { %s50_s26 = ssub.s32 %s5205_s28, %s4669_s30  ;;  %s53_s4 = sadd.s32 1, %s5206_s24 }
 0x1b9   : > { %p51_p8 = scmp.eq.s32.totalorder %s50_s26, 0  ;;  %p60_p13 = scmp.ne.s32.totalorder %s5206_s24, %s5207_s2 }
 0x1ba   : > { %p61_p0 = scmp.eq.s32.totalorder %s5205_s28, 0  ;;  %p66_p1 = scmp.ne.s32.totalorder %s5207_s2, %s5208_s5 }
 0x1bb   : > { %s4680_s10 = scalar_select %p51_p8, %s5206_s24, %s53_s4  }
 0x1bc   : > { %p4682_p3 = por %p61_p0, %p60_p13  ;;  %p5211_p2 = scmp.eq.s32.totalorder %s5209_s1, 0 }
 0x1bd   : > { %p536_p5 = scmp.eq.s32.totalorder %s5209_s1, 1  ;;  %p542_p7 = scmp.eq.s32.totalorder %s2927_s6, 1 }
 0x1be   : > { %p4688_p6 = por %p5211_p2, %p66_p1  ;;  %p3443_p9 = scmp.lt.s32.totalorder %s5205_s28, 2 }
 0x1bf   : > { %s756_s29 = sand.u32 1, %s5206_s24   ;;  %p4695_p10 = por %p536_p5, %p60_p13 }
 0x1c0   : > { %p4699_p11 = por %p542_p7, %p66_p1  ;;  %s2946_s18 = sshll.u32 %s756_s29, 3 }
 0x1c1   : > { %s5213_s25 = scalar_select %p4695_p10, 1, 0 }
 0x1c2   : > { %s5214_s0 = scalar_select %p4699_p11, 1, 0 }
 0x1c3   : > { %s2947_s3 = sshll.u32 %s5205_s28, 7  ;;  %s5215_s26 = sld [smem:[#allocation46_spill]] }
 0x1c4   : > { %s760_s24 = scalar_lea.vmem [#allocation2], %s2946_s18  ;;  %p4713_p12 = pnand %p3443_p9, %p4682_p3 }
 0x1c5   : > { %s767_s1 = sshll.u32 %s760_s24, 4  ;;  %s757_s28 = scalar_lea.sflag [#allocation3], %s756_s29  ;;  %s4709_s1 = int_to_ptr.vmem [resolvable:$true] %s767_s1 }
 0x1c6   : > { %p4026_p8 = pneg %p4713_p12 }
 0x1c9   : > { %s4707_s4 = scalar_lea.hbm %s5215_s26, %s2947_s3  ;;  %s4029_s2 = scalar_lea.hbm %s5215_s26, 256 }
 0x1ca   : > { %s4024_s7 = scalar_lea.hbm %s4707_s4, 128  ;;  %p4030_p1 = scmp.lt.u32.totalorder %s4707_s4, %s5215_s26 }
 0x1cb   : > { %p4025_p4 = scmp.ne.s32.totalorder %s4707_s4, %s4024_s7  ;;  %p4031_p3 = scmp.lt.u32.totalorder %s4029_s2, %s4024_s7 }
 0x1cc   : > { %p4033_p5 = scmp.lt.u32.totalorder %s4024_s7, %s4707_s4 }
 0x1cd   : > { %p4027_p13 = pnand %p4026_p8, %p4025_p4  ;;  %p4032_p2 = por %p4031_p3, %p4030_p1 }
 0x1cf   : > { %p4028_p0 = pneg %p4027_p13  ;;  %p4034_p7 = por %p4033_p5, %p4032_p2 }
 0x1d1   : > { %p4035_p9 = pnand %p4034_p7, %p4028_p0 }
 0x1d3   : > { %4038 = shalt.err (!%p4035_p9)
}
 0x1d4   : > { %s4039_s29 = scalar_lea.vmem %s4709_s1, 128  ;;  %s4172_s24 = smov [#allocation2]  }
 0x1d5   : > { %p4040_p4 = scmp.ne.s32.totalorder %s4709_s1, %s4039_s29  ;;  %s4044_s18 = sshll.u32 %s4172_s24, 4  ;;  %s4045_s18 = int_to_ptr.vmem [resolvable:$false] %s4044_s18 }
 0x1d6   : > { %s4046_s3 = scalar_lea.vmem %s4045_s18, 256  ;;  %p4047_p10 = scmp.lt.s32.totalorder %s4709_s1, %s4045_s18 }
 0x1d7   : > { %p4042_p13 = pnand %p4040_p4, %p4026_p8  ;;  %p4048_p1 = scmp.lt.s32.totalorder %s4046_s3, %s4039_s29 }
 0x1d9   : > { %p4043_p11 = pneg %p4042_p13  ;;  %p4049_p3 = por %p4048_p1, %p4047_p10 }
 0x1db   : > { %p4050_p2 = pnand %p4049_p3, %p4043_p11 }
 0x1dd   : > { %4053 = shalt.err (!%p4050_p2)
}
 0x1de   : > { %3422 = dma.hbm_to_vmem [thread:$0]  (!%p4713_p12), %s4707_s4, 128, %s4709_s1, %s757_s28  }
 0x1df   : > { %s5217_s7 = sld [smem:[#allocation45_spill]] }
 0x1e5   : > { %p5218_p0 = scmp.ne.s32.totalorder %s5217_s7, 0 }
 0x1e6   : > { %s5219_s2 = sld [smem:[#allocation41_spill]] (!%p5218_p0) }
 0x1e7   : > { %784 = sbr.rel (%p5218_p0) target bundleno = 6809 (0x1a99), region = 108 }
 0x1ec   : > { %s4745_s22 = sand.u32 (!%p5218_p0), 1, %s5219_s2  }
 0x1ed   : > { %s5161_s5 = sshll.u32 (!%p5218_p0), %s4745_s22, 3  ;;  %s787_s29 = scalar_lea.sflag (!%p5218_p0), [#allocation3], %s4745_s22 }
 0x1ee   : > { %s790_s24 = scalar_lea.vmem [#allocation2], %s5161_s5 }
 0x1ef   : > { %4099 = dma.done.wait (%p4688_p6), %s787_s29, 128  }
 0x1f0   : > { %4101 = vsyncadd (%p4688_p6), %s787_s29, 4294967168  ;;  %s5220_s4 = sld [smem:[#allocation44_spill]] }
 0x1f6   : > { %p5221_p10 = scmp.eq.s32.totalorder %s5220_s4, 0 }
 0x1f8   : > { %4103 = dma.done.wait (%p5221_p10), [#allocation6], 32   ;;  %p5222_p11 = pmov %p5221_p10 }
 0x1f9   : > { %p5223_p12 = pmov %p5221_p10 }
 0x1fa   : > { %4105 = vsyncadd (%p5222_p11), [#allocation6], 4294967264 }
 0x1fb   : > { %4107 = dma.done.wait (%p5223_p12), [#allocation9], 32   ;;  %p5224_p8 = pmov %p5221_p10 }
 0x1fd   : > { %4109 = vsyncadd (%p5224_p8), [#allocation9], 4294967264  ;;  %p5225_p5 = pmov %p5224_p8 }
 0x1ff   : > { %4111 = dma.done.wait (%p5225_p5), [#allocation12], 272   ;;  %p5226_p7 = pmov %p5225_p5 }
 0x200   : > { %p5227_p6 = pmov %p5225_p5 }
 0x201   : > { %4113 = vsyncadd (%p5226_p7), [#allocation12], 4294967024 }
 0x202   : > { %4115 = dma.done.wait (%p5227_p6), [#allocation15], 272   ;;  %p5228_p9 = pmov %p5225_p5 }
 0x203   : > { %p5229_p4 = pmov %p5225_p5 }
 0x204   : > { %4117 = vsyncadd (%p5228_p9), [#allocation15], 4294967024 }
 0x205   : > { %4119 = dma.done.wait (%p5229_p4), [#allocation18], 32   ;;  %p5230_p13 = pmov %p5229_p4 }
 0x206   : > { %p5231_p1 = pmov %p5229_p4 }
 0x207   : > { %4121 = vsyncadd (%p5230_p13), [#allocation18], 4294967264 }
 0x208   : > { %4123 = dma.done.wait (%p5231_p1), [#allocation21], 272   ;;  %p5232_p3 = pmov %p5231_p1 }
 0x209   : > { %p5233_p2 = pmov %p5231_p1 }
 0x20a   : > { %4125 = vsyncadd (%p5232_p3), [#allocation21], 4294967024 }
 0x20b   : > { %4127 = dma.done.wait (%p5233_p2), [#allocation24], 32   ;;  %p5234_p0 = pmov %p5231_p1 }
 0x20d   : > { %4129 = vsyncadd (%p5234_p0), [#allocation24], 4294967264  ;;  %p5235_p10 = pmov %p5234_p0 }
 0x20e   : > { %p5236_p11 = pmov %p5234_p0 }
 0x20f   : > { %4131 = dma.done.wait (%p5235_p10), [#allocation27], 32  }
 0x210   : > { %4133 = vsyncadd (%p5236_p11), [#allocation27], 4294967264  ;;  %v4173_v0 = vmov 0.0   ;;  %vm4174_vm0 = vmmov 0   ;;  %s5237_s6 = sld [smem:[#allocation48_spill]]  ;;  %v4799_v3 = vld [vmem:[%s790_s24] sm:$0xff]  ;;  %v996_v16 = vlaneseq }
 0x211   : > { %3097 = vmatprep.subr.bf16.mxu0 %v4173_v0  ;;  %3101 = vmatprep.mubr.msk.bf16.mxu0 %vm4174_vm0, %v4173_v0  ;;  %vm951_vm1 = vcmask 261120   ;;  %v927_v4 = vpack.c.bf16 %v4799_v3, %v4799_v3  ;;  %v2969_v5 = vld [vmem:[#allocation5] ss:$0 sm:$0xff]  ;;  %s4175_s3 = smov 64   ;;  %s5171_s7 = smov 96   ;;  %vm1080_vm2 = vcmask 1043456  }
 0x212   : > { %3105 = vmatprep.subr.bf16.mxu1 %v4173_v0  ;;  %3107 = vmatprep.mubr.msk.bf16.mxu1 %vm4174_vm0, %v4173_v0  ;;  %s5168_s2 = smov 88   ;;  %vm1016_vm3 = vcmask 64512   ;;  %v997_v17 = vshrl.u32 %v996_v16, 7  ;;  %v999_v18 = vand.u32 127, %v996_v16  ;;  %s5169_s29 = smov 120   ;;  %vm1787_vm5 = vcmask 523264  }
 0x213   : > { %s5163_s24 = smov 80   ;;  %s5166_s23 = smov 112   ;;  %vm1890_vm6 = vcmask 130048  }
 0x214   : > { %vm1000_vm4 = vcmp.gt.s32.totalorder %v999_v18, %v997_v17  ;;  %s5238_s18 = sld [smem:[#allocation50_spill]]  ;;  %s5162_s1 = smov 72  }
 0x215   : > { %v4824_v19 = vsel %vm1000_vm4, -1e+09, %v4173_v0  ;;  %s5164_s28 = smov 104   ;;  %s4185_s5 = smov 40  }
 0x216   : > { %v3524_v1 = vld [vmem:[%s5237_s6] sm:$0xff]   ;;  %v3525_v2 = vld [vmem:[%s5237_s6 + $0x8] sm:$0xff]   ;;  %p920_p12 = scmp.lt.s32.totalorder %s5220_s4, 1  ;;  %s5241_s6 = sld [smem:[#allocation47_spill]] }
 0x217   : > { %3098 = vmatpush3.bf16.msra.mxu0 %v3524_v1  ;;  %s2680_s9 = scalar_lea.sflag [#allocation4], %s4745_s22  ;;  %p5253_p5 = scmp.ne.s32.totalorder %s5213_s25, 0 }
 0x218   : > { %3099 = vmatprep.subr.bf16.mxu0 %v4173_v0 }
 0x21a   : > { %v1002_v41 = vld [vmem:[%s5238_s18] sm:$0xf] }
 0x21b   : > { %3100 = vmatpush3.bf16.msra.mxu0 %v3525_v2  ;;  %v1129_v42 = vsel %vm1080_vm2, %v1002_v41, 0 }
 0x21c   : > { %3111 = vmatprep.subr.bf16.mxu0 %v4173_v0 }
 0x21e   : > { %3102 = vmatmul.mubr.msk.bf16.vlgmr.msra.gmra.mrb[0].mxu0 %vm951_vm1, %v927_v4 }
 0x21f   : > { %3113 = vmatprep.mubr.msk.bf16.mxu0 %vm4174_vm0, %v4173_v0 }
 0x2f1   : > { %v989_v6 = vpop.f32.mrb[0].mxu0 }
 0x2f2   : > { %v990_v7 = vadd.f32 %v2969_v5, %v989_v6  ;;  %v3103_v8 = vpop.f32.mrb[1].mxu0 }
 0x2f3   : > { %v992_v9 = vpop.f32.mrb[2].mxu0 }
 0x2f4   : > { %v4808_v10 = vpack.c.bf16 %v990_v7, %v990_v7  ;;  %v3104_v11 = vpop.f32.mrb[3].mxu0 }
 0x2f6   : > { %1075 = vrot.lane.b32.xlu1 %v4808_v10, %s4175_s3  ;;  %1014 = vrot.lane.b32.xlu0 %v4808_v10, %s5171_s7  ;;  %s4181_s3 = smov 48   ;;  %s5244_s7 = smov 88  }
 0x2fa   : > { %1174 = vrot.lane.b32.xlu1 %v4808_v10, %s5168_s2 }
 0x368   : > { %v1076_v12 = vpop.permute.xlu1 %1075  ;;  %v1015_v13 = vpop.permute.xlu0 %1014 }
 0x369   : > { %v1082_v14 = vsel %vm1080_vm2, %v1076_v12, 0  ;;  %v1021_v15 = vsel %vm1016_vm3, %v1015_v13, 0 }
 0x36a   : > { %3106 = vmatpush3.bf16.xpose.msra.mxu1 %v1021_v15  ;;  %3112 = vmatpush3.bf16.msra.mxu0 %v1082_v14 }
 0x36b   : > { %3123 = vmatprep.subr.bf16.mxu0 %v4173_v0  ;;  %3117 = vmatprep.subr.bf16.mxu1 %v4173_v0 }
 0x36c   : > { %v1175_v31 = vpop.permute.xlu1 %1174 }
 0x36d   : > { %v1180_v37 = vsel %vm1016_vm3, %v1175_v31, 0 }
 0x371   : > { %3108 = vmatmul.mubr.msk.bf16.vlgmr.msra.gmra.mrb[0].mxu1 %vm1016_vm3, %v4808_v10 }
 0x372   : > { %3119 = vmatprep.mubr.msk.bf16.mxu1 %vm4174_vm0, %v4173_v0  ;;  %3118 = vmatpush3.bf16.msra.mxu1 %v1129_v42 }
 0x373   : > { %3129 = vmatprep.subr.bf16.mxu1 %v4173_v0 }
 0x444   : > { %v1057_v20 = vpop.f32.mrb[0].mxu1 }
 0x445   : > { %v1058_v21 = vadd.f32 %v1057_v20, %v4824_v19  ;;  %v3109_v22 = vpop.f32.mrb[1].mxu1 }
 0x446   : > { %v1060_v23 = vpop.f32.mrb[2].mxu1 }
 0x447   : > { %v3110_v24 = vpop.f32.mrb[3].mxu1  ;;  %v1063_v25 = vsel %vm1016_vm3, %v1058_v21, -inf }
 0x448   : > { %1064 = vmax.xlane.f32.xlu0 %v1063_v25  ;;  %v1003_v25 = vld [vmem:[%s5238_s18 + $0x4] sm:$0xf] }
 0x4d5   : > { %v1065_v26 = vpop.xlane.xlu0 %1064 }
 0x4d6   : > { %v1066_v27 = vsub.f32 %v1058_v21, %v1065_v26  ;;  %v1287_v26 = vsel %vm1080_vm2, %v1003_v25, 0 }
 0x4d8   : > { %v1067_v28 = vmul.f32 1.442695, %v1066_v27 }
 0x4da   : > { %3538 = vpow2.f32 %v1067_v28 }
 0x4e4   : > { %v3539_v29 = vpop.eup %3538 }
 0x4e5   : > { %v1069_v30 = vsel %vm1016_vm3, %v3539_v29, 0.0 }
 0x4e6   : > { %1070 = vadd.xlane.f32.xlu1 %v1069_v30 }
 0x4f7   : > { %1172 = vrot.lane.b32.xlu1 %v4808_v10, %s5169_s29 }
 0x4fb   : > { %1332 = vrot.lane.b32.xlu1 %v4808_v10, %s5163_s24 }
 0x4ff   : > { %1330 = vrot.lane.b32.xlu1 %v4808_v10, %s5166_s23  ;;  %s5249_s23 = sld [smem:[#allocation59_spill]] }
 0x573   : > { %v1071_v32 = vpop.xlane.xlu1 %1070 }
 0x574   : > { %3540 = vrcp.f32 %v1071_v32 }
 0x577   : > { %v1173_v36 = vpop.permute.xlu1 %1172 }
 0x57b   : > { %v1333_v38 = vpop.permute.xlu1 %1332 }
 0x57c   : > { %v1338_v39 = vsel %vm1016_vm3, %v1333_v38, 0 }
 0x57e   : > { %v3541_v33 = vpop.eup %3540 }
 0x57f   : > { %v1073_v34 = vmul.f32 %v3541_v33, %v3539_v29  ;;  %v1331_v40 = vpop.permute.xlu1 %1330 }
 0x581   : > { %v1074_v35 = vpack.c.bf16 %v1073_v34, %v1073_v34 }
 0x583   : > { %3114 = vmatmul.mubr.msk.bf16.vlgmr.msra.gmra.mrb[4].mxu0 %vm1016_vm3, %v1074_v35 }
 0x584   : > { %3124 = vmatpush3.bf16.xpose.msra.mxu0 %v1180_v37  ;;  %3125 = vmatprep.mubr.msk.bf16.mxu0 %vm4174_vm0, %v4173_v0  ;;  %v1004_v37 = vld [vmem:[%s5238_s18 + $0x8] sm:$0xf] }
 0x585   : > { %3141 = vmatprep.subr.bf16.mxu0 %v4173_v0  ;;  %v1445_v41 = vsel %vm1080_vm2, %v1004_v37, 0 }
 0x58b   : > { %3126 = vmatmul.mubr.msk.bf16.vlgmr.msra.gmra.mrb[8].mxu0 %vm1016_vm3, %v1173_v36 }
 0x58c   : > { %3142 = vmatpush3.bf16.xpose.msra.mxu0 %v1338_v39  ;;  %3143 = vmatprep.mubr.msk.bf16.mxu0 %vm4174_vm0, %v4173_v0 }
 0x58d   : > { %3147 = vmatprep.subr.bf16.mxu0 %v4173_v0 }
 0x593   : > { %3144 = vmatmul.mubr.msk.bf16.vlgmr.msra.gmra.mrb[12].mxu0 %vm1016_vm3, %v1331_v40 }
 0x594   : > { %3149 = vmatprep.mubr.msk.bf16.mxu0 %vm4174_vm0, %v4173_v0 }
 0x656   : > { %v1118_v43 = vpop.f32.mrb[4].mxu0 }
 0x657   : > { %v1124_v44 = vpack.c.bf16 %v1118_v43, %v1118_v43  ;;  %v3115_v45 = vpop.f32.mrb[5].mxu0 }
 0x658   : > { %v1121_v46 = vpop.f32.mrb[6].mxu0 }
 0x659   : > { %v3116_v47 = vpop.f32.mrb[7].mxu0  ;;  %3120 = vmatmul.mubr.msk.bf16.vlgmr.msra.gmra.mrb[4].mxu1 %vm1016_vm3, %v1124_v44 }
 0x65a   : > { %3131 = vmatprep.mubr.msk.bf16.mxu1 %vm4174_vm0, %v4173_v0 }
 0x65e   : > { %v1216_v48 = vpop.f32.mrb[8].mxu0 }
 0x65f   : > { %v3127_v49 = vpop.f32.mrb[9].mxu0  ;;  %v1217_v58 = vadd.f32 %v1216_v48, %v4824_v19 }
 0x660   : > { %v1219_v50 = vpop.f32.mrb[10].mxu0 }
 0x661   : > { %v3128_v51 = vpop.f32.mrb[11].mxu0  ;;  %v1222_v59 = vsel %vm1016_vm3, %v1217_v58, -inf }
 0x666   : > { %v1374_v52 = vpop.f32.mrb[12].mxu0 }
 0x667   : > { %v1375_v53 = vadd.f32 %v1374_v52, %v4824_v19  ;;  %v3145_v54 = vpop.f32.mrb[13].mxu0 }
 0x668   : > { %v1377_v55 = vpop.f32.mrb[14].mxu0 }
 0x669   : > { %v3146_v56 = vpop.f32.mrb[15].mxu0  ;;  %v1380_v57 = vsel %vm1016_vm3, %v1375_v53, -inf }
 0x66a   : > { %1381 = vmax.xlane.f32.xlu0 %v1380_v57 }
 0x680   : > { %1392 = vrot.lane.b32.xlu0 %v4808_v10, %s4181_s3  ;;  %s4184_s3 = smov 56  }
 0x684   : > { %1490 = vrot.lane.b32.xlu0 %v4808_v10, %s5162_s1  ;;  %s5247_s1 = smov 104  }
 0x688   : > { %1488 = vrot.lane.b32.xlu0 %v4808_v10, %s5164_s28  ;;  %s921_s28 = scalar_select %p920_p12, %s5220_s4, 1 }
 0x68a   : > { %s3029_s29 = sshll.u32 %s921_s28, 4  ;;  %s5246_s28 = smov 80  }
 0x68b   : > { %s924_s8 = scalar_lea.vmem %s5241_s6, %s3029_s29  ;;  %s5243_s6 = smov 120  }
 0x68c   : > { %s5245_s29 = smov 112  }
 0x6a7   : > { %1223 = vmax.xlane.f32.xlu0 %v1222_v59 }
 0x6f7   : > { %v1382_v60 = vpop.xlane.xlu0 %1381 }
 0x6f8   : > { %v1383_v61 = vsub.f32 %v1375_v53, %v1382_v60  ;;  %v1005_v53 = vld [vmem:[%s5238_s18 + $0xc] sm:$0xf] }
 0x6f9   : > { %v1603_v56 = vsel %vm1080_vm2, %v1005_v53, 0 }
 0x6fa   : > { %v1384_v62 = vmul.f32 1.442695, %v1383_v61 }
 0x6fb   : > { %v1393_v63 = vpop.permute.xlu0 %1392 }
 0x6fc   : > { %3542 = vpow2.f32 %v1384_v62  ;;  %v1398_v1 = vsel %vm1080_vm2, %v1393_v63, 0  ;;  %v3527_v62 = vld [vmem:[#allocation11 + $0x8] sm:$0xff]   ;;  %v2973_v63 = vld [vmem:[#allocation7] ss:$0 sm:$0xff] }
 0x6fd   : > { %3148 = vmatpush3.bf16.msra.mxu0 %v1398_v1 }
 0x6fe   : > { %3159 = vmatprep.subr.bf16.mxu0 %v4173_v0 }
 0x6ff   : > { %v1491_v5 = vpop.permute.xlu0 %1490 }
 0x700   : > { %v1496_v17 = vsel %vm1016_vm3, %v1491_v5, 0 }
 0x703   : > { %v1489_v6 = vpop.permute.xlu0 %1488 }
 0x706   : > { %v3543_v2 = vpop.eup %3542 }
 0x707   : > { %v1386_v4 = vsel %vm1016_vm3, %v3543_v2, 0.0 }
 0x708   : > { %1387 = vadd.xlane.f32.xlu1 %v1386_v4 }
 0x734   : > { %v1224_v7 = vpop.xlane.xlu0 %1223 }
 0x735   : > { %v1225_v8 = vsub.f32 %v1217_v58, %v1224_v7 }
 0x737   : > { %v1226_v9 = vmul.f32 1.442695, %v1225_v8 }
 0x739   : > { %3544 = vpow2.f32 %v1226_v9 }
 0x743   : > { %v3545_v11 = vpop.eup %3544 }
 0x744   : > { %v1228_v12 = vsel %vm1016_vm3, %v3545_v11, 0.0 }
 0x745   : > { %1229 = vadd.xlane.f32.xlu1 %v1228_v12 }
 0x756   : > { %1234 = vrot.lane.b32.xlu1 %v4808_v10, %s4184_s3  ;;  %s5239_s3 = sld [smem:[#allocation56_spill]] }
 0x75c   : > { %s5240_s24 = smov %s5239_s3 }
 0x75d   : > { %v3529_v9 = vld [vmem:[%s5240_s24 + $0x8] sm:$0xff]   ;;  %v3531_v12 = vld [vmem:[%s5240_s24 + $0x18] sm:$0xff]  }
 0x795   : > { %v1388_v13 = vpop.xlane.xlu1 %1387 }
 0x796   : > { %3546 = vrcp.f32 %v1388_v13  ;;  %v1677_v13 = vld [vmem:[%s924_s8] sm:$0xff] }
 0x7a0   : > { %v3547_v14 = vpop.eup %3546 }
 0x7a1   : > { %v1390_v15 = vmul.f32 %v3547_v14, %v3543_v2  ;;  %v1678_v14 = vld [vmem:[%s924_s8 + $0x8] sm:$0xff]  ;;  %s5242_s8 = smov 96  }
 0x7a3   : > { %v1391_v16 = vpack.c.bf16 %v1390_v15, %v1390_v15  ;;  %v1679_v15 = vpack.c.bf16 %v1678_v14, %v1677_v13 }
 0x7a5   : > { %3150 = vmatmul.mubr.msk.bf16.vlgmr.msra.gmra.mrb[16].mxu0 %vm1016_vm3, %v1391_v16 }
 0x7a6   : > { %3160 = vmatpush3.bf16.xpose.msra.mxu0 %v1496_v17  ;;  %3161 = vmatprep.mubr.msk.bf16.mxu0 %vm4174_vm0, %v4173_v0 }
 0x7a7   : > { %3177 = vmatprep.subr.bf16.mxu0 %v4173_v0 }
 0x7ad   : > { %3162 = vmatmul.mubr.msk.bf16.vlgmr.msra.gmra.mrb[20].mxu0 %vm1016_vm3, %v1489_v6  ;;  %v3528_v6 = vld [vmem:[%s5239_s3] sm:$0xff]   ;;  %s5250_s3 = sshll.u32 %s4745_s22, 3 }
 0x7ae   : > { %3181 = vmatprep.mubr.msk.bf16.mxu0 %vm4174_vm0, %v4173_v0  ;;  %s919_s2 = scalar_lea.vmem [#allocation29], %s5250_s3 }
 0x7d2   : > { %v1230_v18 = vpop.xlane.xlu1 %1229 }
 0x7d3   : > { %3548 = vrcp.f32 %v1230_v18 }
 0x7d6   : > { %v1235_v20 = vpop.permute.xlu1 %1234 }
 0x7d7   : > { %v1240_v21 = vsel %vm1080_vm2, %v1235_v20, 0 }
 0x7d8   : > { %3130 = vmatpush3.bf16.msra.mxu1 %v1240_v21  ;;  %v2992_v21 = vld [vmem:[#allocation14] ss:$0 sm:$0xff] }
 0x7d9   : > { %3135 = vmatprep.subr.bf16.mxu1 %v4173_v0 }
 0x7dd   : > { %v3549_v22 = vpop.eup %3548 }
 0x7de   : > { %v1232_v23 = vmul.f32 %v3549_v22, %v3545_v11  ;;  %v3530_v11 = vld [vmem:[%s5240_s24 + $0x10] sm:$0xff]  }
 0x7e0   : > { %v1233_v24 = vpack.c.bf16 %v1232_v23, %v1232_v23 }
 0x7e2   : > { %3132 = vmatmul.mubr.msk.bf16.vlgmr.msra.gmra.mrb[8].mxu1 %vm1016_vm3, %v1233_v24 }
 0x7e3   : > { %3137 = vmatprep.mubr.msk.bf16.mxu1 %vm4174_vm0, %v4173_v0  ;;  %3136 = vmatpush3.bf16.msra.mxu1 %v1287_v26 }
 0x7e4   : > { %3153 = vmatprep.subr.bf16.mxu1 %v4173_v0 }
 0x878   : > { %v1434_v27 = vpop.f32.mrb[16].mxu0 }
 0x879   : > { %v3151_v28 = vpop.f32.mrb[17].mxu0 }
 0x87a   : > { %v1437_v29 = vpop.f32.mrb[18].mxu0 }
 0x87b   : > { %v3152_v30 = vpop.f32.mrb[19].mxu0  ;;  %v2988_v29 = vld [vmem:[#allocation13] ss:$0 sm:$0xff] }
 0x880   : > { %v1532_v31 = vpop.f32.mrb[20].mxu0 }
 0x881   : > { %v1533_v32 = vadd.f32 %v1532_v31, %v4824_v19  ;;  %v3163_v33 = vpop.f32.mrb[21].mxu0  ;;  %v1440_v19 = vpack.c.bf16 %v1434_v27, %v1434_v27 }
 0x882   : > { %v1535_v34 = vpop.f32.mrb[22].mxu0 }
 0x883   : > { %v3164_v35 = vpop.f32.mrb[23].mxu0  ;;  %v1538_v36 = vsel %vm1016_vm3, %v1533_v32, -inf }
 0x884   : > { %1539 = vmax.xlane.f32.xlu1 %v1538_v36 }
 0x8b5   : > { %v1276_v38 = vpop.f32.mrb[8].mxu1 }
 0x8b6   : > { %v1282_v39 = vpack.c.bf16 %v1276_v38, %v1276_v38  ;;  %v3133_v40 = vpop.f32.mrb[9].mxu1 }
 0x8b7   : > { %v1279_v42 = vpop.f32.mrb[10].mxu1 }
 0x8b8   : > { %v3134_v43 = vpop.f32.mrb[11].mxu1  ;;  %3138 = vmatmul.mubr.msk.bf16.vlgmr.msra.gmra.mrb[4].mxu1 %vm1016_vm3, %v1282_v39 }
 0x8b9   : > { %3154 = vmatpush3.bf16.msra.mxu1 %v1445_v41  ;;  %3155 = vmatprep.mubr.msk.bf16.mxu1 %vm4174_vm0, %v4173_v0 }
 0x8ba   : > { %3165 = vmatprep.subr.bf16.mxu1 %v4173_v0 }
 0x8c4   : > { %3156 = vmatmul.mubr.msk.bf16.vlgmr.msra.gmra.mrb[4].mxu1 %vm1016_vm3, %v1440_v19 }
 0x8c5   : > { %3167 = vmatprep.mubr.msk.bf16.mxu1 %vm4174_vm0, %v4173_v0 }
 0x911   : > { %v1540_v44 = vpop.xlane.xlu1 %1539 }
 0x912   : > { %v1541_v45 = vsub.f32 %v1533_v32, %v1540_v44 }
 0x914   : > { %v1542_v46 = vmul.f32 1.442695, %v1541_v45 }
 0x916   : > { %3550 = vpow2.f32 %v1542_v46 }
 0x920   : > { %v3551_v47 = vpop.eup %3550 }
 0x921   : > { %v1544_v48 = vsel %vm1016_vm3, %v3551_v47, 0.0 }
 0x922   : > { %1545 = vadd.xlane.f32.xlu0 %v1544_v48 }
 0x938   : > { %1550 = vrot.lane.b32.xlu0 %v4808_v10, %s4185_s5  ;;  %v3526_v10 = vld [vmem:[#allocation11] sm:$0xff]   ;;  %s5248_s5 = smov 72  }
 0x939   : > { %3178 = vmatpush3.bf16.msra.mxu0 %v3526_v10 }
 0x93a   : > { %3179 = vmatprep.subr.bf16.mxu0 %v4173_v0 }
 0x93d   : > { %3180 = vmatpush3.bf16.msra.mxu0 %v3527_v62 }
 0x93e   : > { %3185 = vmatprep.subr.bf16.mxu0 %v4173_v0 }
 0x9af   : > { %v1546_v49 = vpop.xlane.xlu0 %1545 }
 0x9b0   : > { %3552 = vrcp.f32 %v1546_v49 }
 0x9b3   : > { %v1551_v50 = vpop.permute.xlu0 %1550 }
 0x9b4   : > { %v1556_v51 = vsel %vm1080_vm2, %v1551_v50, 0  ;;  %v1833_v50 = vld [vmem:[#allocation16] sm:$0xf] }
 0x9b5   : > { %3166 = vmatpush3.bf16.msra.mxu1 %v1556_v51  ;;  %v1955_v51 = vsel %vm1080_vm2, %v1833_v50, 0 }
 0x9b6   : > { %3171 = vmatprep.subr.bf16.mxu1 %v4173_v0 }
 0x9ba   : > { %v3553_v52 = vpop.eup %3552 }
 0x9bb   : > { %v1548_v54 = vmul.f32 %v3553_v52, %v3551_v47 }
 0x9bd   : > { %v1549_v55 = vpack.c.bf16 %v1548_v54, %v1548_v54 }
 0x9bf   : > { %3168 = vmatmul.mubr.msk.bf16.vlgmr.msra.gmra.mrb[12].mxu1 %vm1016_vm3, %v1549_v55 }
 0x9c0   : > { %3172 = vmatpush3.bf16.msra.mxu1 %v1603_v56  ;;  %3173 = vmatprep.mubr.msk.bf16.mxu1 %vm4174_vm0, %v4173_v0 }
 0x9c1   : > { %3197 = vmatprep.subr.bf16.mxu1 %v4173_v0 }
 0xa92   : > { %v1592_v57 = vpop.f32.mrb[12].mxu1 }
 0xa93   : > { %v1598_v58 = vpack.c.bf16 %v1592_v57, %v1592_v57  ;;  %v3169_v59 = vpop.f32.mrb[13].mxu1 }
 0xa94   : > { %v1595_v60 = vpop.f32.mrb[14].mxu1 }
 0xa95   : > { %v3170_v61 = vpop.f32.mrb[15].mxu1  ;;  %3174 = vmatmul.mubr.msk.bf16.vlgmr.msra.gmra.mrb[4].mxu1 %vm1016_vm3, %v1598_v58 }
 0xa96   : > { %3199 = vmatprep.mubr.msk.bf16.mxu1 %vm4174_vm0, %v4173_v0 }
 0xb68   : > { %v1639_v1 = vpop.f32.mrb[4].mxu1 }
 0xb69   : > { %v4919_v2 = vadd.f32 %v2973_v63, %v1639_v1  ;;  %v3175_v4 = vpop.f32.mrb[5].mxu1 }
 0xb6a   : > { %v1642_v5 = vpop.f32.mrb[6].mxu1 }
 0xb6b   : > { %v1680_v7 = vpack.c.bf16 %v4919_v2, %v4919_v2  ;;  %v3176_v8 = vpop.f32.mrb[7].mxu1 }
 0xb6d   : > { %3182 = vmatmul.mubr.msk.bf16.vlgmr.msra.gmra.mrb[24].mxu0 %vm951_vm1, %v1680_v7 }
 0xb6e   : > { %3186 = vmatpush3.bf16.msra.mxu0 %v3528_v6  ;;  %3193 = vmatprep.mubr.msk.bf16.mxu0 %vm4174_vm0, %v4173_v0  ;;  %v1834_v6 = vld [vmem:[#allocation16 + $0x4] sm:$0xf] }
 0xb6f   : > { %3187 = vmatprep.subr.bf16.mxu0 %v4173_v0  ;;  %v2112_v7 = vsel %vm1080_vm2, %v1834_v6, 0 }
 0xb72   : > { %3188 = vmatpush3.bf16.msra.mxu0 %v3529_v9 }
 0xb73   : > { %3189 = vmatprep.subr.bf16.mxu0 %v4173_v0 }
 0xb76   : > { %3190 = vmatpush3.bf16.msra.mxu0 %v3530_v11 }
 0xb77   : > { %3191 = vmatprep.subr.bf16.mxu0 %v4173_v0 }
 0xb7a   : > { %3192 = vmatpush3.bf16.msra.mxu0 %v3531_v12 }
 0xb7b   : > { %3209 = vmatprep.subr.bf16.mxu0 %v4173_v0 }
 0xb7d   : > { %3194 = vmatmul.mubr.msk.bf16.vlgmr.msra.gmra.mrb[28].mxu0 %vm1787_vm5, %v1679_v15 }
 0xb7e   : > { %3211 = vmatprep.mubr.msk.bf16.mxu0 %vm4174_vm0, %v4173_v0  ;;  %3210 = vmatpush3.bf16.msra.mxu0 %v1955_v51  ;;  %v1835_v51 = vld [vmem:[#allocation16 + $0x8] sm:$0xf] }
 0xb7f   : > { %3221 = vmatprep.subr.bf16.mxu0 %v4173_v0 }
 0xc40   : > { %v1741_v16 = vpop.f32.mrb[24].mxu0 }
 0xc41   : > { %v3183_v17 = vpop.f32.mrb[25].mxu0  ;;  %v1742_v31 = vadd.f32 %v2988_v29, %v1741_v16 }
 0xc42   : > { %v1744_v18 = vpop.f32.mrb[26].mxu0 }
 0xc43   : > { %v3184_v20 = vpop.f32.mrb[27].mxu0  ;;  %v4956_v32 = vpack.c.bf16 %v1742_v31, %v1742_v31 }
 0xc50   : > { %v1825_v22 = vpop.f32.mrb[28].mxu0 }
 0xc51   : > { %v3195_v23 = vpop.f32.mrb[29].mxu0  ;;  %v1826_v25 = vadd.f32 %v2992_v21, %v1825_v22 }
 0xc52   : > { %v1828_v24 = vpop.f32.mrb[30].mxu0 }
 0xc53   : > { %v1829_v26 = vadd.f32 %v2992_v21, %v1828_v24  ;;  %v3196_v27 = vpop.f32.mrb[31].mxu0 }
 0xc55   : > { %v4949_v28 = vpack.c.bf16 %v1829_v26, %v1826_v25 }
 0xc57   : > { %1904 = vrot.lane.b32.xlu1 %v4949_v28, %s5242_s8  ;;  %v1848_v30 = vsel %vm1016_vm3, %v4949_v28, 0  ;;  %s2693_s8 = sshll.u32 %s919_s2, 4  ;;  %s5073_s8 = int_to_ptr.vmem [resolvable:$true] %s2693_s8 }
 0xc58   : > { %3198 = vmatpush3.bf16.xpose.msra.mxu1 %v1848_v30  ;;  %s4054_s11 = scalar_lea.vmem %s5073_s8, 128 }
 0xc59   : > { %3203 = vmatprep.subr.bf16.mxu1 %v4173_v0  ;;  %p4055_p8 = scmp.ne.s32.totalorder %s5073_s8, %s4054_s11 }
 0xc5b   : > { %p4056_p7 = pnand %p4055_p8, %p5253_p5 }
 0xc5d   : > { %p4057_p6 = pneg %p4056_p7 }
 0xc5f   : > { %3200 = vmatmul.mubr.msk.bf16.vlgmr.msra.gmra.mrb[16].mxu1 %vm1016_vm3, %v4956_v32 }
 0xc60   : > { %3205 = vmatprep.mubr.msk.bf16.mxu1 %vm4174_vm0, %v4173_v0 }
 0xcc9   : > { %v1905_v33 = vpop.permute.xlu1 %1904 }
 0xcca   : > { %3204 = vmatpush3.bf16.msra.mxu1 %v1905_v33 }
 0xccb   : > { %3215 = vmatprep.subr.bf16.mxu1 %v4173_v0 }
 0xd32   : > { %v1884_v34 = vpop.f32.mrb[16].mxu1 }
 0xd33   : > { %v3201_v35 = vpop.f32.mrb[17].mxu1  ;;  %v1891_v36 = vsel %vm1890_vm6, %v1884_v34, -inf }
 0xd34   : > { %1892 = vmax.xlane.f32.xlu0 %v1891_v36  ;;  %v1887_v37 = vpop.f32.mrb[18].mxu1 }
 0xd35   : > { %v3202_v38 = vpop.f32.mrb[19].mxu1 }
 0xdc1   : > { %v1893_v39 = vpop.xlane.xlu0 %1892 }
 0xdc2   : > { %v1894_v40 = vsub.f32 %v1884_v34, %v1893_v39  ;;  %v2998_v39 = vld [vmem:[#allocation17] ss:$0 sm:$0xff] }
 0xdc4   : > { %v1895_v41 = vmul.f32 1.442695, %v1894_v40 }
 0xdc6   : > { %3554 = vpow2.f32 %v1895_v41 }
 0xdd0   : > { %v3555_v42 = vpop.eup %3554 }
 0xdd1   : > { %v1897_v43 = vsel %vm1890_vm6, %v3555_v42, 0.0 }
 0xdd2   : > { %1898 = vadd.xlane.f32.xlu1 %v1897_v43 }
 0xde3   : > { %2001 = vrot.lane.b32.xlu1 %v4949_v28, %s5243_s6 }
 0xde7   : > { %1999 = vrot.lane.b32.xlu1 %v4956_v32, %s5243_s6 }
 0xe5f   : > { %v1899_v19 = vpop.xlane.xlu1 %1898 }
 0xe60   : > { %3556 = vrcp.f32 %v1899_v19 }
 0xe63   : > { %v2002_v46 = vpop.permute.xlu1 %2001 }
 0xe64   : > { %v2007_v48 = vsel %vm1016_vm3, %v2002_v46, 0 }
 0xe67   : > { %v2000_v49 = vpop.permute.xlu1 %1999 }
 0xe6a   : > { %v3557_v44 = vpop.eup %3556 }
 0xe6b   : > { %v1901_v45 = vmul.f32 %v3557_v44, %v3555_v42 }
 0xe6d   : > { %v1902_v47 = vpack.c.bf16 %v1901_v45, %v1901_v45 }
 0xe6f   : > { %3206 = vmatmul.mubr.msk.bf16.vlgmr.msra.gmra.mrb[20].mxu1 %vm1890_vm6, %v1902_v47 }
 0xe70   : > { %3216 = vmatpush3.bf16.xpose.msra.mxu1 %v2007_v48  ;;  %3217 = vmatprep.mubr.msk.bf16.mxu1 %vm4174_vm0, %v4173_v0 }
 0xe71   : > { %3227 = vmatprep.subr.bf16.mxu1 %v4173_v0 }
 0xe77   : > { %3218 = vmatmul.mubr.msk.bf16.vlgmr.msra.gmra.mrb[24].mxu1 %vm1016_vm3, %v2000_v49 }
 0xe78   : > { %3229 = vmatprep.mubr.msk.bf16.mxu1 %vm4174_vm0, %v4173_v0  ;;  %3228 = vmatpush3.bf16.msra.mxu1 %v2112_v7 }
 0xe79   : > { %3239 = vmatprep.subr.bf16.mxu1 %v4173_v0 }
 0xf42   : > { %v1944_v52 = vpop.f32.mrb[20].mxu1 }
 0xf43   : > { %v1950_v53 = vpack.c.bf16 %v1944_v52, %v1944_v52  ;;  %v3207_v54 = vpop.f32.mrb[21].mxu1  ;;  %v2268_v52 = vsel %vm1080_vm2, %v1835_v51, 0  ;;  %v3533_v51 = vld [vmem:[#allocation22 + $0x8] sm:$0xff]  }
 0xf44   : > { %v1947_v55 = vpop.f32.mrb[22].mxu1 }
 0xf45   : > { %v3208_v56 = vpop.f32.mrb[23].mxu1  ;;  %3212 = vmatmul.mubr.msk.bf16.vlgmr.msra.gmra.mrb[32].mxu0 %vm1016_vm3, %v1950_v53 }
 0xf46   : > { %3223 = vmatprep.mubr.msk.bf16.mxu0 %vm4174_vm0, %v4173_v0 }
 0xf4a   : > { %v2043_v10 = vpop.f32.mrb[24].mxu1 }
 0xf4b   : > { %v3219_v57 = vpop.f32.mrb[25].mxu1  ;;  %v2049_v58 = vsel %vm1890_vm6, %v2043_v10, -inf }
 0xf4c   : > { %2050 = vmax.xlane.f32.xlu0 %v2049_v58  ;;  %v2046_v59 = vpop.f32.mrb[26].mxu1 }
 0xf4d   : > { %v3220_v60 = vpop.f32.mrb[27].mxu1 }
 0xf62   : > { %2061 = vrot.lane.b32.xlu0 %v4949_v28, %s5244_s7 }
 0xf66   : > { %2157 = vrot.lane.b32.xlu0 %v4949_v28, %s5245_s29 }
 0xf6a   : > { %2155 = vrot.lane.b32.xlu0 %v4956_v32, %s5245_s29  ;;  %s5251_s29 = sld [smem:[#allocation60_spill]] }
 0xfd9   : > { %v2051_v61 = vpop.xlane.xlu0 %2050 }
 0xfda   : > { %v2052_v62 = vsub.f32 %v2043_v10, %v2051_v61 }
 0xfdc   : > { %v2053_v63 = vmul.f32 1.442695, %v2052_v62  ;;  %v1646_v62 = vadd.f32 %v4919_v2, %v4799_v3 }
 0xfdd   : > { %v2062_v1 = vpop.permute.xlu0 %2061 }
 0xfde   : > { %3558 = vpow2.f32 %v2053_v63  ;;  %3222 = vmatpush3.bf16.msra.mxu0 %v2062_v1  ;;  %v1649_v63 = vsel %vm951_vm1, %v1646_v62, 0.0 }
 0xfdf   : > { %3233 = vmatprep.subr.bf16.mxu0 %v4173_v0 }
 0xfe1   : > { %v2158_v16 = vpop.permute.xlu0 %2157 }
 0xfe2   : > { %v2163_v18 = vsel %vm1016_vm3, %v2158_v16, 0 }
 0xfe5   : > { %v2156_v20 = vpop.permute.xlu0 %2155 }
 0xfe8   : > { %v3559_v4 = vpop.eup %3558 }
 0xfe9   : > { %v2055_v5 = vsel %vm1890_vm6, %v3559_v4, 0.0 }
 0xfea   : > { %2056 = vadd.xlane.f32.xlu1 %v2055_v5 }
 0xffb   : > { %2217 = vrot.lane.b32.xlu1 %v4949_v28, %s5246_s28 }
0x1018   : > { %v1991_v8 = vpop.f32.mrb[32].mxu0 }
0x1019   : > { %v3213_v9 = vpop.f32.mrb[33].mxu0  ;;  %v1997_v40 = vadd.f32 %v2998_v39, %v1991_v8 }
0x101a   : > { %v1994_v11 = vpop.f32.mrb[34].mxu0 }
0x101b   : > { %v3214_v12 = vpop.f32.mrb[35].mxu0 }
0x1077   : > { %v2057_v13 = vpop.xlane.xlu1 %2056 }
0x1078   : > { %3560 = vrcp.f32 %v2057_v13 }
0x107b   : > { %v2218_v25 = vpop.permute.xlu1 %2217 }
0x1082   : > { %v3561_v14 = vpop.eup %3560 }
0x1083   : > { %v2059_v15 = vmul.f32 %v3561_v14, %v3559_v4 }
0x1085   : > { %v2060_v17 = vpack.c.bf16 %v2059_v15, %v2059_v15 }
0x1087   : > { %3224 = vmatmul.mubr.msk.bf16.vlgmr.msra.gmra.mrb[36].mxu0 %vm1890_vm6, %v2060_v17  ;;  %v1836_v17 = vld [vmem:[#allocation16 + $0xc] sm:$0xf] }
0x1088   : > { %3234 = vmatpush3.bf16.xpose.msra.mxu0 %v2163_v18  ;;  %3235 = vmatprep.mubr.msk.bf16.mxu0 %vm4174_vm0, %v4173_v0  ;;  %v2424_v18 = vsel %vm1080_vm2, %v1836_v17, 0 }
0x1089   : > { %3245 = vmatprep.subr.bf16.mxu0 %v4173_v0 }
0x108f   : > { %3236 = vmatmul.mubr.msk.bf16.vlgmr.msra.gmra.mrb[40].mxu0 %vm1016_vm3, %v2156_v20 }
0x1090   : > { %3247 = vmatprep.mubr.msk.bf16.mxu0 %vm4174_vm0, %v4173_v0  ;;  %3246 = vmatpush3.bf16.msra.mxu0 %v2268_v52  ;;  %v3534_v52 = vld [vmem:[%s5249_s23] sm:$0xff]  }
0x1091   : > { %3257 = vmatprep.subr.bf16.mxu0 %v4173_v0 }
0x115a   : > { %v2101_v21 = vpop.f32.mrb[36].mxu0 }
0x115b   : > { %v2107_v22 = vpack.c.bf16 %v2101_v21, %v2101_v21  ;;  %v3225_v23 = vpop.f32.mrb[37].mxu0 }
0x115c   : > { %v2104_v24 = vpop.f32.mrb[38].mxu0 }
0x115d   : > { %v3226_v26 = vpop.f32.mrb[39].mxu0  ;;  %3230 = vmatmul.mubr.msk.bf16.vlgmr.msra.gmra.mrb[28].mxu1 %vm1016_vm3, %v2107_v22 }
0x115e   : > { %3240 = vmatpush3.bf16.msra.mxu1 %v2218_v25  ;;  %3241 = vmatprep.mubr.msk.bf16.mxu1 %vm4174_vm0, %v4173_v0 }
0x115f   : > { %3251 = vmatprep.subr.bf16.mxu1 %v4173_v0 }
0x1162   : > { %v2199_v27 = vpop.f32.mrb[40].mxu0 }
0x1163   : > { %v3237_v29 = vpop.f32.mrb[41].mxu0  ;;  %v2205_v30 = vsel %vm1890_vm6, %v2199_v27, -inf }
0x1164   : > { %2206 = vmax.xlane.f32.xlu0 %v2205_v30  ;;  %v2202_v31 = vpop.f32.mrb[42].mxu0 }
0x1165   : > { %v3238_v33 = vpop.f32.mrb[43].mxu0 }
0x11f1   : > { %v2207_v34 = vpop.xlane.xlu0 %2206 }
0x11f2   : > { %v2208_v35 = vsub.f32 %v2199_v27, %v2207_v34 }
0x11f4   : > { %v2209_v36 = vmul.f32 1.442695, %v2208_v35 }
0x11f6   : > { %3562 = vpow2.f32 %v2209_v36  ;;  %v2986_v36 = vld [vmem:[#allocation8] ss:$0 sm:$0xff] }
0x1200   : > { %v3563_v37 = vpop.eup %3562 }
0x1201   : > { %v2211_v38 = vsel %vm1890_vm6, %v3563_v37, 0.0 }
0x1202   : > { %2212 = vadd.xlane.f32.xlu1 %v2211_v38  ;;  %v2987_v38 = vld [vmem:[#allocation10] ss:$0 sm:$0xff] }
0x1213   : > { %2313 = vrot.lane.b32.xlu1 %v4949_v28, %s5247_s1 }
0x1217   : > { %2311 = vrot.lane.b32.xlu1 %v4956_v32, %s5247_s1  ;;  %s5252_s1 = smov %s5251_s29 }
0x1230   : > { %v2148_v41 = vpop.f32.mrb[28].mxu1 }
0x1231   : > { %v2154_v42 = vadd.f32 %v2148_v41, %v1997_v40  ;;  %v3231_v43 = vpop.f32.mrb[29].mxu1 }
0x1232   : > { %v2151_v19 = vpop.f32.mrb[30].mxu1 }
0x1233   : > { %v3232_v44 = vpop.f32.mrb[31].mxu1 }
0x128f   : > { %v2213_v45 = vpop.xlane.xlu1 %2212 }
0x1290   : > { %3564 = vrcp.f32 %v2213_v45 }
0x1293   : > { %v2314_v48 = vpop.permute.xlu1 %2313 }
0x1294   : > { %v2319_v50 = vsel %vm1016_vm3, %v2314_v48, 0 }
0x1297   : > { %v2312_v32 = vpop.permute.xlu1 %2311 }
0x129a   : > { %v3565_v46 = vpop.eup %3564 }
0x129b   : > { %v2215_v47 = vmul.f32 %v3565_v46, %v3563_v37 }
0x129d   : > { %v2216_v49 = vpack.c.bf16 %v2215_v47, %v2215_v47 }
0x129f   : > { %3242 = vmatmul.mubr.msk.bf16.vlgmr.msra.gmra.mrb[32].mxu1 %vm1890_vm6, %v2216_v49 }
0x12a0   : > { %3252 = vmatpush3.bf16.xpose.msra.mxu1 %v2319_v50  ;;  %3253 = vmatprep.mubr.msk.bf16.mxu1 %vm4174_vm0, %v4173_v0 }
0x12a1   : > { %3263 = vmatprep.subr.bf16.mxu1 %v4173_v0 }
0x12a7   : > { %3254 = vmatmul.mubr.msk.bf16.vlgmr.msra.gmra.mrb[36].mxu1 %vm1016_vm3, %v2312_v32  ;;  %v3532_v32 = vld [vmem:[#allocation22] sm:$0xff]  }
0x12a8   : > { %3265 = vmatprep.mubr.msk.bf16.mxu1 %vm4174_vm0, %v4173_v0  ;;  %3264 = vmatpush3.bf16.msra.mxu1 %v2424_v18 }
0x12a9   : > { %3277 = vmatprep.subr.bf16.mxu1 %v4173_v0 }
0x1372   : > { %v2257_v53 = vpop.f32.mrb[32].mxu1 }
0x1373   : > { %v2263_v54 = vpack.c.bf16 %v2257_v53, %v2257_v53  ;;  %v3243_v55 = vpop.f32.mrb[33].mxu1  ;;  %v3535_v53 = vld [vmem:[%s5249_s23 + $0x8] sm:$0xff]  }
0x1374   : > { %v2260_v56 = vpop.f32.mrb[34].mxu1 }
0x1375   : > { %v3244_v10 = vpop.f32.mrb[35].mxu1  ;;  %3248 = vmatmul.mubr.msk.bf16.vlgmr.msra.gmra.mrb[44].mxu0 %vm1016_vm3, %v2263_v54 }
0x1376   : > { %3259 = vmatprep.mubr.msk.bf16.mxu0 %vm4174_vm0, %v4173_v0 }
0x137a   : > { %v2355_v57 = vpop.f32.mrb[36].mxu1 }
0x137b   : > { %v3255_v58 = vpop.f32.mrb[37].mxu1  ;;  %v2361_v59 = vsel %vm1890_vm6, %v2355_v57, -inf }
0x137c   : > { %2362 = vmax.xlane.f32.xlu0 %v2361_v59  ;;  %v2358_v60 = vpop.f32.mrb[38].mxu1  ;;  %v3012_v59 = vld [vmem:[#allocation20] ss:$0 sm:$0xff] }
0x137d   : > { %v3256_v61 = vpop.f32.mrb[39].mxu1 }
0x1392   : > { %2373 = vrot.lane.b32.xlu0 %v4949_v28, %s5248_s5  ;;  %s3026_s5 = sshll.u32 %s5220_s4, 7  ;;  %s4186_s4 = smov [#allocation29]  }
0x1393   : > { %s5071_s28 = scalar_lea.hbm %s5251_s29, %s3026_s5  ;;  %s4058_s3 = sshll.u32 %s4186_s4, 4  ;;  %s4059_s3 = int_to_ptr.vmem [resolvable:$false] %s4058_s3 }
0x1394   : > { %s4060_s12 = scalar_lea.vmem %s4059_s3, 256  ;;  %p4061_p9 = scmp.lt.s32.totalorder %s5073_s8, %s4059_s3 }
0x1395   : > { %p4062_p4 = scmp.lt.s32.totalorder %s4060_s12, %s4054_s11 }
0x1397   : > { %p4063_p13 = por %p4062_p4, %p4061_p9 }
0x1399   : > { %p4064_p1 = pnand %p4063_p13, %p4057_p6 }
0x13b1   : > { %1650 = vadd.xlane.f32.xlu0 %v1649_v63  ;;  %v3536_v63 = vld [vmem:[%s5249_s23 + $0x10] sm:$0xff]  }
0x1409   : > { %v2363_v1 = vpop.xlane.xlu0 %2362 }
0x140a   : > { %v2364_v4 = vsub.f32 %v2355_v57, %v2363_v1  ;;  %v3011_v57 = vld [vmem:[#allocation19] ss:$0 sm:$0xff] }
0x140b   : > { %v3537_v1 = vld [vmem:[%s5249_s23 + $0x18] sm:$0xff]  }
0x140c   : > { %v2365_v5 = vmul.f32 1.442695, %v2364_v4  ;;  %v3013_v4 = vld [vmem:[#allocation23] ss:$0 sm:$0xff] }
0x140d   : > { %v2374_v6 = vpop.permute.xlu0 %2373 }
0x140e   : > { %3566 = vpow2.f32 %v2365_v5  ;;  %3258 = vmatpush3.bf16.msra.mxu0 %v2374_v6 }
0x140f   : > { %3269 = vmatprep.subr.bf16.mxu0 %v4173_v0 }
0x1418   : > { %v3567_v7 = vpop.eup %3566 }
0x1419   : > { %v2367_v8 = vsel %vm1890_vm6, %v3567_v7, 0.0 }
0x141a   : > { %2368 = vadd.xlane.f32.xlu1 %v2367_v8 }
0x143e   : > { %v1651_v9 = vpop.xlane.xlu0 %1650 }
0x143f   : > { %v1653_v28 = vmul.f32 0.03125, %v1651_v9 }
0x1441   : > { %v1654_v11 = vsub.f32 %v1646_v62, %v1653_v28 }
0x1443   : > { %v1655_v12 = vmul.f32 %v1654_v11, %v1654_v11 }
0x1445   : > { %v1656_v3 = vsel %vm951_vm1, %v1655_v12, 0.0  ;;  %v3017_v12 = vld [vmem:[#allocation25] ss:$0 sm:$0xff] }
0x1446   : > { %1657 = vadd.xlane.f32.xlu1 %v1656_v3 }
0x1448   : > { %v2304_v2 = vpop.f32.mrb[44].mxu0 }
0x1449   : > { %v2310_v13 = vadd.f32 %v2304_v2, %v2154_v42  ;;  %v3249_v14 = vpop.f32.mrb[45].mxu0 }
0x144a   : > { %v2307_v15 = vpop.f32.mrb[46].mxu0 }
0x144b   : > { %v3250_v16 = vpop.f32.mrb[47].mxu0 }
0x14a7   : > { %v2369_v20 = vpop.xlane.xlu1 %2368 }
0x14a8   : > { %3568 = vrcp.f32 %v2369_v20 }
0x14b2   : > { %v3569_v21 = vpop.eup %3568 }
0x14b3   : > { %v2371_v22 = vmul.f32 %v3569_v21, %v3567_v7 }
0x14b5   : > { %v2372_v23 = vpack.c.bf16 %v2371_v22, %v2371_v22 }
0x14b7   : > { %3260 = vmatmul.mubr.msk.bf16.vlgmr.msra.gmra.mrb[48].mxu0 %vm1890_vm6, %v2372_v23 }
0x14b8   : > { %3273 = vmatprep.mubr.msk.bf16.mxu0 %vm4174_vm0, %v4173_v0  ;;  %3270 = vmatpush3.bf16.msra.mxu0 %v3532_v32 }
0x14b9   : > { %3271 = vmatprep.subr.bf16.mxu0 %v4173_v0 }
0x14bc   : > { %3272 = vmatpush3.bf16.msra.mxu0 %v3533_v51 }
0x14d3   : > { %v1658_v30 = vpop.xlane.xlu1 %1657 }
0x14d4   : > { %v1659_v31 = vmul.f32 0.03125, %v1658_v30  ;;  %v3024_v30 = vld [vmem:[#allocation28] ss:$0 sm:$0xff] }
0x14d6   : > { %v1660_v33 = vadd.f32 1e-05, %v1659_v31 }
0x14d8   : > { %3570 = vrsqrt.f32 %v1660_v33 }
0x14e2   : > { %v3571_v34 = vpop.eup %3570 }
0x14e3   : > { %v1662_v35 = vmul.f32 %v3571_v34, %v1654_v11 }
0x14e5   : > { %v1669_v37 = vmul.f32 %v2986_v36, %v1662_v35 }
0x14e7   : > { %v1676_v42 = vadd.f32 %v2987_v38, %v1669_v37 }
0x158a   : > { %v2413_v24 = vpop.f32.mrb[48].mxu0 }
0x158b   : > { %v2419_v25 = vpack.c.bf16 %v2413_v24, %v2413_v24  ;;  %v3261_v26 = vpop.f32.mrb[49].mxu0 }
0x158c   : > { %v2416_v27 = vpop.f32.mrb[50].mxu0 }
0x158d   : > { %v3262_v29 = vpop.f32.mrb[51].mxu0  ;;  %3266 = vmatmul.mubr.msk.bf16.vlgmr.msra.gmra.mrb[40].mxu1 %vm1016_vm3, %v2419_v25  ;;  %v3023_v27 = vld [vmem:[#allocation26] ss:$0 sm:$0xff] }
0x158e   : > { %3285 = vmatprep.mubr.msk.bf16.mxu1 %vm4174_vm0, %v4173_v0  ;;  %3278 = vmatpush3.bf16.msra.mxu1 %v3534_v52 }
0x158f   : > { %3279 = vmatprep.subr.bf16.mxu1 %v4173_v0 }
0x1592   : > { %3280 = vmatpush3.bf16.msra.mxu1 %v3535_v53 }
0x1593   : > { %3281 = vmatprep.subr.bf16.mxu1 %v4173_v0 }
0x1596   : > { %3282 = vmatpush3.bf16.msra.mxu1 %v3536_v63 }
0x1597   : > { %3283 = vmatprep.subr.bf16.mxu1 %v4173_v0 }
0x159a   : > { %3284 = vmatpush3.bf16.msra.mxu1 %v3537_v1 }
0x1660   : > { %v2460_v39 = vpop.f32.mrb[40].mxu1 }
0x1661   : > { %v2466_v40 = vadd.f32 %v2460_v39, %v2310_v13  ;;  %v3267_v41 = vpop.f32.mrb[41].mxu1 }
0x1662   : > { %v2463_v43 = vpop.f32.mrb[42].mxu1 }
0x1663   : > { %v3268_v19 = vpop.f32.mrb[43].mxu1  ;;  %v2467_v44 = vadd.f32 %v2466_v40, %v1676_v42 }
0x1665   : > { %v2470_v45 = vsel %vm951_vm1, %v2467_v44, 0.0 }
0x1666   : > { %2471 = vadd.xlane.f32.xlu1 %v2470_v45 }
0x16f3   : > { %v2472_v46 = vpop.xlane.xlu1 %2471 }
0x16f4   : > { %v2473_v47 = vmul.f32 0.03125, %v2472_v46 }
0x16f6   : > { %v2474_v48 = vsub.f32 %v2467_v44, %v2473_v47 }
0x16f8   : > { %v2475_v49 = vmul.f32 %v2474_v48, %v2474_v48 }
0x16fa   : > { %v2476_v50 = vsel %vm951_vm1, %v2475_v49, 0.0 }
0x16fb   : > { %2477 = vadd.xlane.f32.xlu1 %v2476_v50 }
0x1788   : > { %v2478_v54 = vpop.xlane.xlu1 %2477 }
0x1789   : > { %v2479_v55 = vmul.f32 0.03125, %v2478_v54 }
0x178b   : > { %v2480_v56 = vadd.f32 1e-05, %v2479_v55 }
0x178d   : > { %3572 = vrsqrt.f32 %v2480_v56 }
0x1797   : > { %v3573_v10 = vpop.eup %3572 }
0x1798   : > { %v2482_v58 = vmul.f32 %v3573_v10, %v2474_v48 }
0x179a   : > { %v2489_v60 = vmul.f32 %v3011_v57, %v2482_v58 }
0x179c   : > { %v2496_v61 = vadd.f32 %v3012_v59, %v2489_v60 }
0x179e   : > { %v2497_v62 = vpack.c.bf16 %v2496_v61, %v2496_v61 }
0x17a0   : > { %3274 = vmatmul.mubr.msk.bf16.vlgmr.msra.gmra.mrb[52].mxu0 %vm951_vm1, %v2497_v62 }
0x1873   : > { %v2558_v5 = vpop.f32.mrb[52].mxu0 }
0x1874   : > { %v2559_v6 = vadd.f32 %v3013_v4, %v2558_v5  ;;  %v3275_v7 = vpop.f32.mrb[53].mxu0 }
0x1875   : > { %v2561_v8 = vpop.f32.mrb[54].mxu0 }
0x1876   : > { %v2564_v9 = vmax.f32 %v2559_v6, 0.0  ;;  %v3276_v28 = vpop.f32.mrb[55].mxu0 }
0x1878   : > { %v2565_v11 = vpack.c.bf16 %v2564_v9, %v2564_v9 }
0x187a   : > { %3286 = vmatmul.mubr.msk.bf16.vlgmr.msra.gmra.mrb[44].mxu1 %vm1787_vm5, %v2565_v11 }
0x194d   : > { %v2642_v3 = vpop.f32.mrb[44].mxu1 }
0x194e   : > { %v2643_v2 = vadd.f32 %v3017_v12, %v2642_v3  ;;  %v3287_v13 = vpop.f32.mrb[45].mxu1 }
0x194f   : > { %v2645_v0 = vpop.f32.mrb[46].mxu1 }
0x1950   : > { %v3288_v14 = vpop.f32.mrb[47].mxu1  ;;  %v2648_v15 = vadd.f32 %v2643_v2, %v2496_v61 }
0x1952   : > { %v2651_v16 = vsel %vm951_vm1, %v2648_v15, 0.0 }
0x1953   : > { %2652 = vadd.xlane.f32.xlu1 %v2651_v16 }
0x19e0   : > { %v2653_v17 = vpop.xlane.xlu1 %2652 }
0x19e1   : > { %v2654_v18 = vmul.f32 0.03125, %v2653_v17 }
0x19e3   : > { %v2655_v20 = vsub.f32 %v2648_v15, %v2654_v18 }
0x19e5   : > { %v2656_v21 = vmul.f32 %v2655_v20, %v2655_v20 }
0x19e7   : > { %v2657_v22 = vsel %vm951_vm1, %v2656_v21, 0.0 }
0x19e8   : > { %2658 = vadd.xlane.f32.xlu1 %v2657_v22 }
0x1a75   : > { %v2659_v23 = vpop.xlane.xlu1 %2658 }
0x1a76   : > { %v2660_v24 = vmul.f32 0.03125, %v2659_v23 }
0x1a78   : > { %v2661_v25 = vadd.f32 1e-05, %v2660_v24 }
0x1a7a   : > { %3574 = vrsqrt.f32 %v2661_v25 }
0x1a84   : > { %v3575_v26 = vpop.eup %3574 }
0x1a85   : > { %v2663_v29 = vmul.f32 %v3575_v26, %v2655_v20 }
0x1a87   : > { %v2670_v31 = vmul.f32 %v3023_v27, %v2663_v29 }
0x1a89   : > { %v2677_v33 = vadd.f32 %v3024_v30, %v2670_v31 }
0x1a8b   : > { %2678 = vst.msk [vmem:[%s919_s2] sm:$0xff] %vm951_vm1, %v2677_v33 }
0x1a8c   : > { %4067 = shalt.err (!%p4064_p1)
}
0x1a8d   : > { %s4068_s22 = scalar_lea.hbm %s5071_s28, 128  ;;  %s4072_s6 = scalar_lea.hbm %s5252_s1, 256 }
0x1a8e   : > { %p4069_p3 = scmp.ne.s32.totalorder %s5071_s28, %s4068_s22  ;;  %p4073_p10 = scmp.lt.u32.totalorder %s5071_s28, %s5252_s1 }
0x1a8f   : > { %p4074_p11 = scmp.lt.u32.totalorder %s4072_s6, %s4068_s22  ;;  %p4076_p8 = scmp.lt.u32.totalorder %s4068_s22, %s5071_s28 }
0x1a90   : > { %p4070_p2 = pnand %p4069_p3, %p5253_p5 }
0x1a91   : > { %p4075_p12 = por %p4074_p11, %p4073_p10 }
0x1a92   : > { %p4071_p0 = pneg %p4070_p2 }
0x1a93   : > { %p4077_p7 = por %p4076_p8, %p4075_p12 }
0x1a95   : > { %p4078_p6 = pnand %p4077_p7, %p4071_p0 }
0x1a97   : > { %4081 = shalt.err (!%p4078_p6)
}
0x1a98   : > { %3368 = dma.vmem_to_hbm [thread:$0]  (%p5253_p5), %s5073_s8, 128, %s5071_s28, %s2680_s9  }
0x1a99 PF: > { %s5254_s11 = sld [smem:[#allocation40_spill]]  ;;  %s5255_s12 = sld [smem:[#allocation43_spill]] }
0x1a9a   : > { %p5256_p9 = scmp.ne.s32.totalorder %s5214_s0, 0 }
0x1a9f   : > { %s2705_s4 = sand.u32 1, %s5254_s11   ;;  %p5257_p4 = scmp.ge.s32.totalorder %s5255_s12, 2 }
0x1aa0   : > { %s2706_s3 = scalar_lea.sflag [#allocation4], %s2705_s4 }
0x1aa1   : > { %p3424_p13 = pnand %p5257_p4, %p5256_p9 }
0x1aa3   : > { %4135 = dma.done.wait (!%p3424_p13), %s2706_s3, 128  }
0x1aa4   : > { %4137 = vsyncadd (!%p3424_p13), %s2706_s3, 4294967168  ;;  %s5258_s3 = sld [smem:[#allocation41_spill]]  ;;  %s5259_s28 = sld [smem:[#allocation42_spill]] }
0x1aa5   : > { %p43_p1 = scmp.ge.s32.totalorder %s4669_s30, 4   ;;  %s5260_s29 = smov %s4680_s10 }
0x1aa7   :  { %45 = sbr.rel (!%p43_p1) target bundleno = 29 (0x1d), region = 220 }
0x1aae   :  { %2711 = vsyncpa [#allocation3], 1 }
0x1aaf   :  { %2713 = vsyncpa [#allocation3 + $0x1], 1 }
0x1ab0   :  { %2714 = vsyncpa [#allocation6], 1 }
0x1ab1   :  { %2715 = vsyncpa [#allocation9], 1 }
0x1ab2   :  { %2716 = vsyncpa [#allocation12], 1 }
0x1ab3   :  { %2717 = vsyncpa [#allocation15], 1 }
0x1ab4   :  { %2718 = vsyncpa [#allocation18], 1 }
0x1ab5   :  { %2719 = vsyncpa [#allocation21], 1 }
0x1ab6   :  { %2720 = vsyncpa [#allocation24], 1 }
0x1ab7   :  { %2721 = vsyncpa [#allocation27], 1 }
0x1ab8   :  { %2722 = vsyncpa [#allocation4], 1 }
0x1ab9   :  { %2724 = vsyncpa [#allocation4 + $0x1], 1 }

</bundles_post_ra>
